<compile_context>
chip_gen: v6e
topology: v6e:2x2x1
jax: 0.10.0
libtpu: 0.0.40
codegen_flags: <defaults>
</compile_context>

<pallas_src>
import jax
import jax.numpy as jnp
from jax import lax
from jax.experimental import pallas as pl
from jax.experimental.pallas import tpu as pltpu


def _gelu_tanh(x):
    # TODO(synk): PyTorch F.gelu defaults to the exact erf form; the tanh
    # approximation (max abs deviation ~3e-3) is used since erf has no
    # guaranteed Mosaic lowering.
    c0 = 0.7978845608028654  # sqrt(2/pi)
    return 0.5 * x * (1.0 + jnp.tanh(c0 * (x + 0.044715 * x * x * x)))


def _ffn_restormer_kernel(x_top_ref, x_mid_ref, x_bot_ref,
                          w1a_ref, b1a_ref, w1b_ref, b1b_ref,
                          wda_ref, bda_ref, wdb_ref, bdb_ref,
                          w2_ref, b2_ref, o_ref):
    # x_mid_ref : (TH, W, C)   row tile, channels on lanes
    # x_top_ref : (1, W, C)    row above the tile (clamped at the border)
    # x_bot_ref : (1, W, C)    row below the tile (clamped at the border)
    # w1a/w1b   : (C, F)       project_in split into the two gating halves
    # wda/wdb   : (9, F)       depthwise 3x3 taps, k = 3*ky + kx
    # w2        : (F, Cp)      project_out (columns zero-padded to Cp)
    # o_ref     : (TH, W, Cp)
    TH, W, C = x_mid_ref.shape
    F = w1a_ref.shape[1]
    Cp = o_ref.shape[-1]
    NP = (TH + 2) * W          # tile rows + 1-row halo on each side, flattened
    N = TH * W

    t = pl.program_id(1)
    nt = pl.num_programs(1)

    # ---- gather the row tile plus its 1-row halo ----------------------------
    xall = jnp.concatenate(
        [x_top_ref[...], x_mid_ref[...], x_bot_ref[...]], axis=0
    ).reshape(NP, C)

    # Row mask: halo rows must become zero padding at the top/bottom of the
    # *image* (they are clamped duplicates there, and project_in adds a bias,
    # so zeroing must happen after project_in).
    rid = lax.broadcasted_iota(jnp.int32, (NP, F), 0)
    kill = ((rid < W) & (t == 0)) | ((rid >= NP - W) & (t == nt - 1))

    # Column masks: zero the wrapped column produced by the horizontal rolls.
    cid = lax.broadcasted_iota(jnp.int32, (W, F), 0)
    col_first = cid == 0
    col_last = cid == W - 1

    wda = wda_ref[...]   # (9, F) -- hoisted, read once per grid step
    wdb = wdb_ref[...]

    def half(w1_ref, b1_ref, wd, bd_ref):
        # project_in for this half: MXU matmul over tile+halo rows, f32 acc.
        y = jnp.dot(xall, w1_ref[...], preferred_element_type=jnp.float32)
        y = y + b1_ref[...]
        y = jnp.where(kill, 0.0, y)                                   # (NP, F)

        # Horizontal (dx) taps: sublane roll of the flattened layout (aligned,
        # XLU); the cross-row wrap lands exactly on the masked boundary column.
        yc = y.reshape(TH + 2, W, F)
        yl = jnp.where(col_first, 0.0,
                       pltpu.roll(y, 1, axis=0).reshape(TH + 2, W, F))
        yr = jnp.where(col_last, 0.0,
                       pltpu.roll(y, NP - 1, axis=0).reshape(TH + 2, W, F))

        # Depthwise 3x3: vertical (dy) shifts are free slices on the major
        # axis; the accumulator starts from the bias (one fewer add pass).
        def wk(k):
            return wd[k].reshape(1, 1, F)

        acc = bd_ref[...].reshape(1, 1, F) + yl[0:TH] * wk(0)
        acc = acc + yc[0:TH] * wk(1)
        acc = acc + yr[0:TH] * wk(2)
        for dy in (1, 2):                                   # static unroll
            acc = acc + yl[dy:dy + TH] * wk(3 * dy + 0)
            acc = acc + yc[dy:dy + TH] * wk(3 * dy + 1)
            acc = acc + yr[dy:dy + TH] * wk(3 * dy + 2)
        return acc                                          # (TH, W, F) f32

    za = half(w1a_ref, b1a_ref, wda, bda_ref)    # gelu branch (x1)
    zb = half(w1b_ref, b1b_ref, wdb, bdb_ref)    # gate branch (x2)

    # ---- gated GELU + project_out (MXU matmul, lane-dense padded output) ----
    g = (_gelu_tanh(za) * zb).reshape(N, F)
    out = jnp.dot(g.astype(w2_ref.dtype), w2_ref[...],
                  preferred_element_type=jnp.float32) + b2_ref[...]
    o_ref[...] = out.reshape(TH, W, Cp).astype(o_ref.dtype)


def _pick_tile_rows(H, W, F2):
    """Largest divisor of H whose per-step f32 working set fits ~12 MiB."""
    per_row = 10 * W * F2 * 4               # rough per-row f32 temporaries (both halves)
    cap = max(1, (12 << 20) // max(per_row, 1))
    if H >= 16:
        cap = min(cap, H // 2)              # >=2 row tiles: megacore + pipelining
    th = 1
    for d in range(1, H + 1):
        if H % d == 0 and d <= cap:
            th = d
    return th


@jax.jit
def feedforward_restormer(x, w_in, b_in, w_dw, b_dw, w_out, b_out):
    """Port of FeedForward_Restormer.forward.

    x      : (B, C, H, W)                  NCHW, like PyTorch
    w_in   : (2F, C, 1, 1), b_in : (2F,)   -- project_in
    w_dw   : (2F, 1, 3, 3), b_dw : (2F,)   -- depthwise conv (groups=2F)
    w_out  : (C,  F, 1, 1), b_out: (C,)    -- project_out
    """
    B, C, H, W = x.shape
    F2 = w_in.shape[0]
    F = w_out.shape[1]
    assert F2 == 2 * F
    # TODO(synk): lift this restriction (free (R,W,C)<->(N,C) reshapes need it).
    assert W % 8 == 0, "W must be a multiple of 8"
    dt = x.dtype

    TH = _pick_tile_rows(H, W, F2)
    nT = H // TH
    Cp = ((C + 127) // 128) * 128            # lane-dense project_out / output store

    # ---- channels-last layout + weight repacking (pure XLA, outside kernel) --
    x_nhwc = jnp.transpose(x, (0, 2, 3, 1))                          # (B, H, W, C)
    w1 = jnp.transpose(w_in[:, :, 0, 0], (1, 0)).astype(dt)          # (C, 2F)
    w1a, w1b = w1[:, :F], w1[:, F:]                                  # split halves
    b1 = b_in.astype(jnp.float32)
    b1a, b1b = b1[:F].reshape(1, F), b1[F:].reshape(1, F)
    wd = jnp.transpose(w_dw[:, 0, :, :].reshape(F2, 9), (1, 0)).astype(jnp.float32)
    wda, wdb = wd[:, :F], wd[:, F:]                                  # (9, F) each
    bd = b_dw.astype(jnp.float32)
    bda, bdb = bd[:F].reshape(1, F), bd[F:].reshape(1, F)
    w2 = jnp.transpose(w_out[:, :, 0, 0], (1, 0)).astype(dt)         # (F, C)
    w2p = jnp.zeros((F, Cp), dt).at[:, :C].set(w2)
    b2p = jnp.zeros((1, Cp), jnp.float32).at[:, :C].set(
        b_out.astype(jnp.float32).reshape(1, C))

    # ---- grid / BlockSpecs ----------------------------------------------------
    grid = (B, nT)
    rep = lambda b, t: (0, 0)
    in_specs = [
        # row above the tile (clamped at the image border; zeroed in-kernel)
        pl.BlockSpec((None, 1, W, C),
                     lambda b, t: (b, jnp.maximum(t * TH - 1, 0), 0, 0)),
        # the row tile itself
        pl.BlockSpec((None, TH, W, C), lambda b, t: (b, t, 0, 0)),
        # row below the tile (clamped at the image border; zeroed in-kernel)
        pl.BlockSpec((None, 1, W, C),
                     lambda b, t: (b, jnp.minimum((t + 1) * TH, H - 1), 0, 0)),
        pl.BlockSpec((C, F), rep), pl.BlockSpec((1, F), rep),        # project_in a
        pl.BlockSpec((C, F), rep), pl.BlockSpec((1, F), rep),        # project_in b
        pl.BlockSpec((9, F), rep), pl.BlockSpec((1, F), rep),        # dwconv a
        pl.BlockSpec((9, F), rep), pl.BlockSpec((1, F), rep),        # dwconv b
        pl.BlockSpec((F, Cp), rep), pl.BlockSpec((1, Cp), rep),      # project_out
    ]
    out_specs = pl.BlockSpec((None, TH, W, Cp), lambda b, t: (b, t, 0, 0))

    # ---- VMEM budget: tiles keep usage far below v7x's 64 MiB ---------------
    f32_tile = (TH + 2) * W * F * 4
    est = (10 * 2 * f32_tile                                  # y / rolled / acc temps
           + 2 * 2 * (TH + 2) * W * C * x.dtype.itemsize      # double-buffered x blocks
           + 2 * TH * W * Cp * x.dtype.itemsize               # double-buffered out block
           + 4 * (2 * C * F + 18 * F + F * Cp + 4 * F + Cp))  # resident weights
    vmem_limit = int(min(max(2 * est, 32 << 20), 48 << 20))

    N = H * W
    cost = pl.CostEstimate(
        flops=int(B * (2 * N * C * F2 + 18 * N * F2 + 2 * N * F * Cp)),
        transcendentals=int(B * N * F),
        bytes_accessed=int(x.dtype.itemsize * B * N * (C + Cp)
                           + 4 * (C * F2 + 9 * F2 + F * Cp + 2 * F2 + Cp)))

    out_p = pl.pallas_call(
        _ffn_restormer_kernel,
        out_shape=jax.ShapeDtypeStruct((B, H, W, Cp), dt),
        grid_spec=pltpu.PrefetchScalarGridSpec(
            num_scalar_prefetch=0,
            grid=grid,
            in_specs=in_specs,
            out_specs=out_specs),
        compiler_params=pltpu.CompilerParams(
            dimension_semantics=("parallel", "parallel"),
            vmem_limit_bytes=vmem_limit),
        cost_estimate=cost,
    )(x_nhwc, x_nhwc, x_nhwc,
      w1a, b1a, w1b, b1b, wda, bda, wdb, bdb, w2p, b2p)

    return jnp.transpose(out_p[:, :, :, :C], (0, 3, 1, 2))           # back to NCHW


# ----------------------------------------------------------------------------
# Pure-JAX reference (same tanh-GELU), for correctness checking only.
# ----------------------------------------------------------------------------
def _reference_forward(x, w_in, b_in, w_dw, b_dw, w_out, b_out):
    hp = lax.Precision.HIGHEST
    y = jnp.einsum('bchw,oc->bohw', x, w_in[:, :, 0, 0], precision=hp)
    y = y + b_in[None, :, None, None]
    y = lax.conv_general_dilated(
        y, w_dw, window_strides=(1, 1), padding=((1, 1), (1, 1)),
        dimension_numbers=('NCHW', 'OIHW', 'NCHW'),
        feature_group_count=y.shape[1], precision=hp)
    y = y + b_dw[None, :, None, None]
    z1, z2 = jnp.split(y, 2, axis=1)
    g = _gelu_tanh(z1) * z2
    out = jnp.einsum('bchw,oc->bohw', g, w_out[:, :, 0, 0], precision=hp)
    return out + b_out[None, :, None, None]


if __name__ == "__main__":
    key = jax.random.PRNGKey(0)
    ks = jax.random.split(key, 7)

    # dim=32, ffn_expansion_factor=2 -> hidden=64, 2*hidden=128 (lane-dense y)
    B, DIM, H, W = 2, 32, 16, 16
    HID = DIM * 2
    F2 = 2 * HID

    x     = jax.random.normal(ks[0], (B, DIM, H, W), jnp.float32)
    w_in  = 0.1 * jax.random.normal(ks[1], (F2, DIM, 1, 1), jnp.float32)
    b_in  = 0.1 * jax.random.normal(ks[2], (F2,), jnp.float32)
    w_dw  = 0.1 * jax.random.normal(ks[3], (F2, 1, 3, 3), jnp.float32)
    b_dw  = 0.1 * jax.random.normal(ks[4], (F2,), jnp.float32)
    w_out = 0.1 * jax.random.normal(ks[5], (DIM, HID, 1, 1), jnp.float32)
    b_out = 0.1 * jax.random.normal(ks[6], (DIM,), jnp.float32)

    out = feedforward_restormer(x, w_in, b_in, w_dw, b_dw, w_out, b_out)
    out = jax.block_until_ready(out)
    assert out.shape == (B, DIM, H, W), out.shape

    ref = _reference_forward(x, w_in, b_in, w_dw, b_dw, w_out, b_out)
    max_err = float(jnp.max(jnp.abs(out - ref)))
    assert jnp.allclose(out, ref, atol=5e-3, rtol=3e-2), f"mismatch, max_err={max_err}"

    print("KERNEL_OK")
</pallas_src>

<mosaic_0001>
module attributes {stable_mosaic.version = 11 : i64} {
  func.func @_ffn_restormer_kernel(%arg0: i32, %arg1: i32, %arg2: memref<1x1x16x32xf32, #tpu.memory_space<vmem>>, %arg3: memref<1x8x16x32xf32, #tpu.memory_space<vmem>>, %arg4: memref<1x1x16x32xf32, #tpu.memory_space<vmem>>, %arg5: memref<32x64xf32, #tpu.memory_space<vmem>>, %arg6: memref<1x64xf32, #tpu.memory_space<vmem>>, %arg7: memref<32x64xf32, #tpu.memory_space<vmem>>, %arg8: memref<1x64xf32, #tpu.memory_space<vmem>>, %arg9: memref<9x64xf32, #tpu.memory_space<vmem>>, %arg10: memref<1x64xf32, #tpu.memory_space<vmem>>, %arg11: memref<9x64xf32, #tpu.memory_space<vmem>>, %arg12: memref<1x64xf32, #tpu.memory_space<vmem>>, %arg13: memref<64x128xf32, #tpu.memory_space<vmem>>, %arg14: memref<1x128xf32, #tpu.memory_space<vmem>>, %arg15: memref<1x8x16x128xf32, #tpu.memory_space<vmem>>) attributes {dimension_semantics = [#tpu.dimension_semantics<parallel>, #tpu.dimension_semantics<parallel>], iteration_bounds = array<i64: 2, 2>, scalar_prefetch = 0 : i64, scratch_operands = 0 : i64, tpu.core_type = #tpu.core_type<tc>, window_params = [{transform_indices = @transform_0, window_bounds = array<i64: 1, 1, 16, 32>}, {transform_indices = @transform_1, window_bounds = array<i64: 1, 8, 16, 32>}, {transform_indices = @transform_2, window_bounds = array<i64: 1, 1, 16, 32>}, {pipeline_mode = #tpu.pipeline_mode<synchronous>, transform_indices = @transform_3, window_bounds = array<i64: 32, 64>}, {pipeline_mode = #tpu.pipeline_mode<synchronous>, transform_indices = @transform_4, window_bounds = array<i64: 1, 64>}, {pipeline_mode = #tpu.pipeline_mode<synchronous>, transform_indices = @transform_5, window_bounds = array<i64: 32, 64>}, {pipeline_mode = #tpu.pipeline_mode<synchronous>, transform_indices = @transform_6, window_bounds = array<i64: 1, 64>}, {pipeline_mode = #tpu.pipeline_mode<synchronous>, transform_indices = @transform_7, window_bounds = array<i64: 9, 64>}, {pipeline_mode = #tpu.pipeline_mode<synchronous>, transform_indices = @transform_8, window_bounds = array<i64: 1, 64>}, {pipeline_mode = #tpu.pipeline_mode<synchronous>, transform_indices = @transform_9, window_bounds = array<i64: 9, 64>}, {pipeline_mode = #tpu.pipeline_mode<synchronous>, transform_indices = @transform_10, window_bounds = array<i64: 1, 64>}, {pipeline_mode = #tpu.pipeline_mode<synchronous>, transform_indices = @transform_11, window_bounds = array<i64: 64, 128>}, {pipeline_mode = #tpu.pipeline_mode<synchronous>, transform_indices = @transform_12, window_bounds = array<i64: 1, 128>}, {transform_indices = @transform_13, window_bounds = array<i64: 1, 8, 16, 128>}]} {
    %c0 = arith.constant 0 : index
    %c0_0 = arith.constant 0 : index
    %c0_1 = arith.constant 0 : index
    %c0_2 = arith.constant 0 : index
    %0 = vector.load %arg2[%c0, %c0_0, %c0_1, %c0_2] : memref<1x1x16x32xf32, #tpu.memory_space<vmem>>, vector<1x1x16x32xf32>
    %1 = vector.shape_cast %0 : vector<1x1x16x32xf32> to vector<1x16x32xf32>
    %c0_3 = arith.constant 0 : index
    %c0_4 = arith.constant 0 : index
    %c0_5 = arith.constant 0 : index
    %c0_6 = arith.constant 0 : index
    %2 = vector.load %arg3[%c0_3, %c0_4, %c0_5, %c0_6] : memref<1x8x16x32xf32, #tpu.memory_space<vmem>>, vector<1x8x16x32xf32>
    %3 = vector.shape_cast %2 : vector<1x8x16x32xf32> to vector<8x16x32xf32>
    %c0_7 = arith.constant 0 : index
    %c0_8 = arith.constant 0 : index
    %c0_9 = arith.constant 0 : index
    %c0_10 = arith.constant 0 : index
    %4 = vector.load %arg4[%c0_7, %c0_8, %c0_9, %c0_10] : memref<1x1x16x32xf32, #tpu.memory_space<vmem>>, vector<1x1x16x32xf32>
    %5 = vector.shape_cast %4 : vector<1x1x16x32xf32> to vector<1x16x32xf32>
    %6 = tpu.concatenate %1, %3, %5 in 0 : vector<1x16x32xf32>, vector<8x16x32xf32>, vector<1x16x32xf32> -> vector<10x16x32xf32>
    %7 = vector.shape_cast %6 : vector<10x16x32xf32> to vector<160x32xf32>
    %8 = tpu.iota {dimensions = array<i32: 0>} : vector<160x64xi32>
    %c16_i32 = arith.constant 16 : i32
    %9 = vector.broadcast %c16_i32 : i32 to vector<160x64xi32>
    %10 = arith.cmpi slt, %8, %9 : vector<160x64xi32>
    %c0_i32 = arith.constant 0 : i32
    %11 = arith.cmpi eq, %arg1, %c0_i32 : i32
    %12 = vector.broadcast %11 : i1 to vector<160x64xi1>
    %13 = arith.andi %10, %12 : vector<160x64xi1>
    %c144_i32 = arith.constant 144 : i32
    %14 = vector.broadcast %c144_i32 : i32 to vector<160x64xi32>
    %15 = arith.cmpi sge, %8, %14 : vector<160x64xi32>
    %c1_i32 = arith.constant 1 : i32
    %16 = arith.cmpi eq, %arg1, %c1_i32 : i32
    %17 = vector.broadcast %16 : i1 to vector<160x64xi1>
    %18 = arith.andi %15, %17 : vector<160x64xi1>
    %19 = arith.ori %13, %18 : vector<160x64xi1>
    %20 = tpu.iota {dimensions = array<i32: 0>} : vector<16x64xi32>
    %c0_i32_11 = arith.constant 0 : i32
    %21 = vector.broadcast %c0_i32_11 : i32 to vector<16x64xi32>
    %22 = arith.cmpi eq, %20, %21 : vector<16x64xi32>
    %c15_i32 = arith.constant 15 : i32
    %23 = vector.broadcast %c15_i32 : i32 to vector<16x64xi32>
    %24 = arith.cmpi eq, %20, %23 : vector<16x64xi32>
    %c0_12 = arith.constant 0 : index
    %c0_13 = arith.constant 0 : index
    %25 = vector.load %arg9[%c0_12, %c0_13] : memref<9x64xf32, #tpu.memory_space<vmem>>, vector<9x64xf32>
    %c0_14 = arith.constant 0 : index
    %c0_15 = arith.constant 0 : index
    %26 = vector.load %arg11[%c0_14, %c0_15] : memref<9x64xf32, #tpu.memory_space<vmem>>, vector<9x64xf32>
    %c0_16 = arith.constant 0 : index
    %c0_17 = arith.constant 0 : index
    %27 = vector.load %arg5[%c0_16, %c0_17] : memref<32x64xf32, #tpu.memory_space<vmem>>, vector<32x64xf32>
    %cst = arith.constant dense<0.000000e+00> : vector<160x64xf32>
    %28 = tpu.matmul %7, %27, %cst {dimension_numbers = #tpu.dot_dimension_numbers<[1], [0], [0], [1], [0, 0, 1, 1], [], []>} : vector<160x32xf32>, vector<32x64xf32>, vector<160x64xf32> -> vector<160x64xf32>
    %c0_18 = arith.constant 0 : index
    %c0_19 = arith.constant 0 : index
    %29 = vector.load %arg6[%c0_18, %c0_19] : memref<1x64xf32, #tpu.memory_space<vmem>>, vector<1x64xf32>
    %30 = vector.broadcast %29 : vector<1x64xf32> to vector<160x64xf32>
    %31 = arith.addf %28, %30 : vector<160x64xf32>
    %cst_20 = arith.constant 0.000000e+00 : f32
    %32 = vector.broadcast %cst_20 : f32 to vector<160x64xf32>
    %33 = arith.select %19, %32, %31 : vector<160x64xi1>, vector<160x64xf32>
    %34 = vector.shape_cast %33 : vector<160x64xf32> to vector<10x16x64xf32>
    %c1_i32_21 = arith.constant 1 : i32
    %35 = tpu.dynamic_rotate %33 by %c1_i32_21 dim 0 : vector<160x64xf32>, i32 -> vector<160x64xf32>
    %36 = vector.shape_cast %35 : vector<160x64xf32> to vector<10x16x64xf32>
    %cst_22 = arith.constant 0.000000e+00 : f32
    %37 = vector.shape_cast %22 : vector<16x64xi1> to vector<1x16x64xi1>
    %38 = vector.broadcast %37 : vector<1x16x64xi1> to vector<10x16x64xi1>
    %39 = vector.broadcast %cst_22 : f32 to vector<10x16x64xf32>
    %40 = arith.select %38, %39, %36 : vector<10x16x64xi1>, vector<10x16x64xf32>
    %c159_i32 = arith.constant 159 : i32
    %41 = tpu.dynamic_rotate %33 by %c159_i32 dim 0 : vector<160x64xf32>, i32 -> vector<160x64xf32>
    %42 = vector.shape_cast %41 : vector<160x64xf32> to vector<10x16x64xf32>
    %cst_23 = arith.constant 0.000000e+00 : f32
    %43 = vector.shape_cast %24 : vector<16x64xi1> to vector<1x16x64xi1>
    %44 = vector.broadcast %43 : vector<1x16x64xi1> to vector<10x16x64xi1>
    %45 = vector.broadcast %cst_23 : f32 to vector<10x16x64xf32>
    %46 = arith.select %44, %45, %42 : vector<10x16x64xi1>, vector<10x16x64xf32>
    %c0_24 = arith.constant 0 : index
    %c0_25 = arith.constant 0 : index
    %47 = vector.load %arg10[%c0_24, %c0_25] : memref<1x64xf32, #tpu.memory_space<vmem>>, vector<1x64xf32>
    %48 = vector.shape_cast %47 : vector<1x64xf32> to vector<1x1x64xf32>
    %49 = vector.extract_strided_slice %40 {offsets = [0, 0, 0], sizes = [8, 16, 64], strides = [1, 1, 1]} : vector<10x16x64xf32> to vector<8x16x64xf32>
    %50 = vector.extract_strided_slice %25 {offsets = [0, 0], sizes = [1, 64], strides = [1, 1]} : vector<9x64xf32> to vector<1x64xf32>
    %51 = vector.shape_cast %50 : vector<1x64xf32> to vector<64xf32>
    %52 = vector.shape_cast %51 : vector<64xf32> to vector<1x1x64xf32>
    %53 = vector.broadcast %52 : vector<1x1x64xf32> to vector<8x16x64xf32>
    %54 = arith.mulf %49, %53 : vector<8x16x64xf32>
    %55 = vector.broadcast %48 : vector<1x1x64xf32> to vector<8x16x64xf32>
    %56 = arith.addf %55, %54 : vector<8x16x64xf32>
    %57 = vector.extract_strided_slice %34 {offsets = [0, 0, 0], sizes = [8, 16, 64], strides = [1, 1, 1]} : vector<10x16x64xf32> to vector<8x16x64xf32>
    %58 = vector.extract_strided_slice %25 {offsets = [1, 0], sizes = [1, 64], strides = [1, 1]} : vector<9x64xf32> to vector<1x64xf32>
    %59 = vector.shape_cast %58 : vector<1x64xf32> to vector<64xf32>
    %60 = vector.shape_cast %59 : vector<64xf32> to vector<1x1x64xf32>
    %61 = vector.broadcast %60 : vector<1x1x64xf32> to vector<8x16x64xf32>
    %62 = arith.mulf %57, %61 : vector<8x16x64xf32>
    %63 = arith.addf %56, %62 : vector<8x16x64xf32>
    %64 = vector.extract_strided_slice %46 {offsets = [0, 0, 0], sizes = [8, 16, 64], strides = [1, 1, 1]} : vector<10x16x64xf32> to vector<8x16x64xf32>
    %65 = vector.extract_strided_slice %25 {offsets = [2, 0], sizes = [1, 64], strides = [1, 1]} : vector<9x64xf32> to vector<1x64xf32>
    %66 = vector.shape_cast %65 : vector<1x64xf32> to vector<64xf32>
    %67 = vector.shape_cast %66 : vector<64xf32> to vector<1x1x64xf32>
    %68 = vector.broadcast %67 : vector<1x1x64xf32> to vector<8x16x64xf32>
    %69 = arith.mulf %64, %68 : vector<8x16x64xf32>
    %70 = arith.addf %63, %69 : vector<8x16x64xf32>
    %71 = vector.extract_strided_slice %40 {offsets = [1, 0, 0], sizes = [8, 16, 64], strides = [1, 1, 1]} : vector<10x16x64xf32> to vector<8x16x64xf32>
    %72 = vector.extract_strided_slice %25 {offsets = [3, 0], sizes = [1, 64], strides = [1, 1]} : vector<9x64xf32> to vector<1x64xf32>
    %73 = vector.shape_cast %72 : vector<1x64xf32> to vector<64xf32>
    %74 = vector.shape_cast %73 : vector<64xf32> to vector<1x1x64xf32>
    %75 = vector.broadcast %74 : vector<1x1x64xf32> to vector<8x16x64xf32>
    %76 = arith.mulf %71, %75 : vector<8x16x64xf32>
    %77 = arith.addf %70, %76 : vector<8x16x64xf32>
    %78 = vector.extract_strided_slice %34 {offsets = [1, 0, 0], sizes = [8, 16, 64], strides = [1, 1, 1]} : vector<10x16x64xf32> to vector<8x16x64xf32>
    %79 = vector.extract_strided_slice %25 {offsets = [4, 0], sizes = [1, 64], strides = [1, 1]} : vector<9x64xf32> to vector<1x64xf32>
    %80 = vector.shape_cast %79 : vector<1x64xf32> to vector<64xf32>
    %81 = vector.shape_cast %80 : vector<64xf32> to vector<1x1x64xf32>
    %82 = vector.broadcast %81 : vector<1x1x64xf32> to vector<8x16x64xf32>
    %83 = arith.mulf %78, %82 : vector<8x16x64xf32>
    %84 = arith.addf %77, %83 : vector<8x16x64xf32>
    %85 = vector.extract_strided_slice %46 {offsets = [1, 0, 0], sizes = [8, 16, 64], strides = [1, 1, 1]} : vector<10x16x64xf32> to vector<8x16x64xf32>
    %86 = vector.extract_strided_slice %25 {offsets = [5, 0], sizes = [1, 64], strides = [1, 1]} : vector<9x64xf32> to vector<1x64xf32>
    %87 = vector.shape_cast %86 : vector<1x64xf32> to vector<64xf32>
    %88 = vector.shape_cast %87 : vector<64xf32> to vector<1x1x64xf32>
    %89 = vector.broadcast %88 : vector<1x1x64xf32> to vector<8x16x64xf32>
    %90 = arith.mulf %85, %89 : vector<8x16x64xf32>
    %91 = arith.addf %84, %90 : vector<8x16x64xf32>
    %92 = vector.extract_strided_slice %40 {offsets = [2, 0, 0], sizes = [8, 16, 64], strides = [1, 1, 1]} : vector<10x16x64xf32> to vector<8x16x64xf32>
    %93 = vector.extract_strided_slice %25 {offsets = [6, 0], sizes = [1, 64], strides = [1, 1]} : vector<9x64xf32> to vector<1x64xf32>
    %94 = vector.shape_cast %93 : vector<1x64xf32> to vector<64xf32>
    %95 = vector.shape_cast %94 : vector<64xf32> to vector<1x1x64xf32>
    %96 = vector.broadcast %95 : vector<1x1x64xf32> to vector<8x16x64xf32>
    %97 = arith.mulf %92, %96 : vector<8x16x64xf32>
    %98 = arith.addf %91, %97 : vector<8x16x64xf32>
    %99 = vector.extract_strided_slice %34 {offsets = [2, 0, 0], sizes = [8, 16, 64], strides = [1, 1, 1]} : vector<10x16x64xf32> to vector<8x16x64xf32>
    %100 = vector.extract_strided_slice %25 {offsets = [7, 0], sizes = [1, 64], strides = [1, 1]} : vector<9x64xf32> to vector<1x64xf32>
    %101 = vector.shape_cast %100 : vector<1x64xf32> to vector<64xf32>
    %102 = vector.shape_cast %101 : vector<64xf32> to vector<1x1x64xf32>
    %103 = vector.broadcast %102 : vector<1x1x64xf32> to vector<8x16x64xf32>
    %104 = arith.mulf %99, %103 : vector<8x16x64xf32>
    %105 = arith.addf %98, %104 : vector<8x16x64xf32>
    %106 = vector.extract_strided_slice %46 {offsets = [2, 0, 0], sizes = [8, 16, 64], strides = [1, 1, 1]} : vector<10x16x64xf32> to vector<8x16x64xf32>
    %107 = vector.extract_strided_slice %25 {offsets = [8, 0], sizes = [1, 64], strides = [1, 1]} : vector<9x64xf32> to vector<1x64xf32>
    %108 = vector.shape_cast %107 : vector<1x64xf32> to vector<64xf32>
    %109 = vector.shape_cast %108 : vector<64xf32> to vector<1x1x64xf32>
    %110 = vector.broadcast %109 : vector<1x1x64xf32> to vector<8x16x64xf32>
    %111 = arith.mulf %106, %110 : vector<8x16x64xf32>
    %112 = arith.addf %105, %111 : vector<8x16x64xf32>
    %c0_26 = arith.constant 0 : index
    %c0_27 = arith.constant 0 : index
    %113 = vector.load %arg7[%c0_26, %c0_27] : memref<32x64xf32, #tpu.memory_space<vmem>>, vector<32x64xf32>
    %cst_28 = arith.constant dense<0.000000e+00> : vector<160x64xf32>
    %114 = tpu.matmul %7, %113, %cst_28 {dimension_numbers = #tpu.dot_dimension_numbers<[1], [0], [0], [1], [0, 0, 1, 1], [], []>} : vector<160x32xf32>, vector<32x64xf32>, vector<160x64xf32> -> vector<160x64xf32>
    %c0_29 = arith.constant 0 : index
    %c0_30 = arith.constant 0 : index
    %115 = vector.load %arg8[%c0_29, %c0_30] : memref<1x64xf32, #tpu.memory_space<vmem>>, vector<1x64xf32>
    %116 = vector.broadcast %115 : vector<1x64xf32> to vector<160x64xf32>
    %117 = arith.addf %114, %116 : vector<160x64xf32>
    %cst_31 = arith.constant 0.000000e+00 : f32
    %118 = vector.broadcast %cst_31 : f32 to vector<160x64xf32>
    %119 = arith.select %19, %118, %117 : vector<160x64xi1>, vector<160x64xf32>
    %120 = vector.shape_cast %119 : vector<160x64xf32> to vector<10x16x64xf32>
    %c1_i32_32 = arith.constant 1 : i32
    %121 = tpu.dynamic_rotate %119 by %c1_i32_32 dim 0 : vector<160x64xf32>, i32 -> vector<160x64xf32>
    %122 = vector.shape_cast %121 : vector<160x64xf32> to vector<10x16x64xf32>
    %cst_33 = arith.constant 0.000000e+00 : f32
    %123 = vector.shape_cast %22 : vector<16x64xi1> to vector<1x16x64xi1>
    %124 = vector.broadcast %123 : vector<1x16x64xi1> to vector<10x16x64xi1>
    %125 = vector.broadcast %cst_33 : f32 to vector<10x16x64xf32>
    %126 = arith.select %124, %125, %122 : vector<10x16x64xi1>, vector<10x16x64xf32>
    %c159_i32_34 = arith.constant 159 : i32
    %127 = tpu.dynamic_rotate %119 by %c159_i32_34 dim 0 : vector<160x64xf32>, i32 -> vector<160x64xf32>
    %128 = vector.shape_cast %127 : vector<160x64xf32> to vector<10x16x64xf32>
    %cst_35 = arith.constant 0.000000e+00 : f32
    %129 = vector.shape_cast %24 : vector<16x64xi1> to vector<1x16x64xi1>
    %130 = vector.broadcast %129 : vector<1x16x64xi1> to vector<10x16x64xi1>
    %131 = vector.broadcast %cst_35 : f32 to vector<10x16x64xf32>
    %132 = arith.select %130, %131, %128 : vector<10x16x64xi1>, vector<10x16x64xf32>
    %c0_36 = arith.constant 0 : index
    %c0_37 = arith.constant 0 : index
    %133 = vector.load %arg12[%c0_36, %c0_37] : memref<1x64xf32, #tpu.memory_space<vmem>>, vector<1x64xf32>
    %134 = vector.shape_cast %133 : vector<1x64xf32> to vector<1x1x64xf32>
    %135 = vector.extract_strided_slice %126 {offsets = [0, 0, 0], sizes = [8, 16, 64], strides = [1, 1, 1]} : vector<10x16x64xf32> to vector<8x16x64xf32>
    %136 = vector.extract_strided_slice %26 {offsets = [0, 0], sizes = [1, 64], strides = [1, 1]} : vector<9x64xf32> to vector<1x64xf32>
    %137 = vector.shape_cast %136 : vector<1x64xf32> to vector<64xf32>
    %138 = vector.shape_cast %137 : vector<64xf32> to vector<1x1x64xf32>
    %139 = vector.broadcast %138 : vector<1x1x64xf32> to vector<8x16x64xf32>
    %140 = arith.mulf %135, %139 : vector<8x16x64xf32>
    %141 = vector.broadcast %134 : vector<1x1x64xf32> to vector<8x16x64xf32>
    %142 = arith.addf %141, %140 : vector<8x16x64xf32>
    %143 = vector.extract_strided_slice %120 {offsets = [0, 0, 0], sizes = [8, 16, 64], strides = [1, 1, 1]} : vector<10x16x64xf32> to vector<8x16x64xf32>
    %144 = vector.extract_strided_slice %26 {offsets = [1, 0], sizes = [1, 64], strides = [1, 1]} : vector<9x64xf32> to vector<1x64xf32>
    %145 = vector.shape_cast %144 : vector<1x64xf32> to vector<64xf32>
    %146 = vector.shape_cast %145 : vector<64xf32> to vector<1x1x64xf32>
    %147 = vector.broadcast %146 : vector<1x1x64xf32> to vector<8x16x64xf32>
    %148 = arith.mulf %143, %147 : vector<8x16x64xf32>
    %149 = arith.addf %142, %148 : vector<8x16x64xf32>
    %150 = vector.extract_strided_slice %132 {offsets = [0, 0, 0], sizes = [8, 16, 64], strides = [1, 1, 1]} : vector<10x16x64xf32> to vector<8x16x64xf32>
    %151 = vector.extract_strided_slice %26 {offsets = [2, 0], sizes = [1, 64], strides = [1, 1]} : vector<9x64xf32> to vector<1x64xf32>
    %152 = vector.shape_cast %151 : vector<1x64xf32> to vector<64xf32>
    %153 = vector.shape_cast %152 : vector<64xf32> to vector<1x1x64xf32>
    %154 = vector.broadcast %153 : vector<1x1x64xf32> to vector<8x16x64xf32>
    %155 = arith.mulf %150, %154 : vector<8x16x64xf32>
    %156 = arith.addf %149, %155 : vector<8x16x64xf32>
    %157 = vector.extract_strided_slice %126 {offsets = [1, 0, 0], sizes = [8, 16, 64], strides = [1, 1, 1]} : vector<10x16x64xf32> to vector<8x16x64xf32>
    %158 = vector.extract_strided_slice %26 {offsets = [3, 0], sizes = [1, 64], strides = [1, 1]} : vector<9x64xf32> to vector<1x64xf32>
    %159 = vector.shape_cast %158 : vector<1x64xf32> to vector<64xf32>
    %160 = vector.shape_cast %159 : vector<64xf32> to vector<1x1x64xf32>
    %161 = vector.broadcast %160 : vector<1x1x64xf32> to vector<8x16x64xf32>
    %162 = arith.mulf %157, %161 : vector<8x16x64xf32>
    %163 = arith.addf %156, %162 : vector<8x16x64xf32>
    %164 = vector.extract_strided_slice %120 {offsets = [1, 0, 0], sizes = [8, 16, 64], strides = [1, 1, 1]} : vector<10x16x64xf32> to vector<8x16x64xf32>
    %165 = vector.extract_strided_slice %26 {offsets = [4, 0], sizes = [1, 64], strides = [1, 1]} : vector<9x64xf32> to vector<1x64xf32>
    %166 = vector.shape_cast %165 : vector<1x64xf32> to vector<64xf32>
    %167 = vector.shape_cast %166 : vector<64xf32> to vector<1x1x64xf32>
    %168 = vector.broadcast %167 : vector<1x1x64xf32> to vector<8x16x64xf32>
    %169 = arith.mulf %164, %168 : vector<8x16x64xf32>
    %170 = arith.addf %163, %169 : vector<8x16x64xf32>
    %171 = vector.extract_strided_slice %132 {offsets = [1, 0, 0], sizes = [8, 16, 64], strides = [1, 1, 1]} : vector<10x16x64xf32> to vector<8x16x64xf32>
    %172 = vector.extract_strided_slice %26 {offsets = [5, 0], sizes = [1, 64], strides = [1, 1]} : vector<9x64xf32> to vector<1x64xf32>
    %173 = vector.shape_cast %172 : vector<1x64xf32> to vector<64xf32>
    %174 = vector.shape_cast %173 : vector<64xf32> to vector<1x1x64xf32>
    %175 = vector.broadcast %174 : vector<1x1x64xf32> to vector<8x16x64xf32>
    %176 = arith.mulf %171, %175 : vector<8x16x64xf32>
    %177 = arith.addf %170, %176 : vector<8x16x64xf32>
    %178 = vector.extract_strided_slice %126 {offsets = [2, 0, 0], sizes = [8, 16, 64], strides = [1, 1, 1]} : vector<10x16x64xf32> to vector<8x16x64xf32>
    %179 = vector.extract_strided_slice %26 {offsets = [6, 0], sizes = [1, 64], strides = [1, 1]} : vector<9x64xf32> to vector<1x64xf32>
    %180 = vector.shape_cast %179 : vector<1x64xf32> to vector<64xf32>
    %181 = vector.shape_cast %180 : vector<64xf32> to vector<1x1x64xf32>
    %182 = vector.broadcast %181 : vector<1x1x64xf32> to vector<8x16x64xf32>
    %183 = arith.mulf %178, %182 : vector<8x16x64xf32>
    %184 = arith.addf %177, %183 : vector<8x16x64xf32>
    %185 = vector.extract_strided_slice %120 {offsets = [2, 0, 0], sizes = [8, 16, 64], strides = [1, 1, 1]} : vector<10x16x64xf32> to vector<8x16x64xf32>
    %186 = vector.extract_strided_slice %26 {offsets = [7, 0], sizes = [1, 64], strides = [1, 1]} : vector<9x64xf32> to vector<1x64xf32>
    %187 = vector.shape_cast %186 : vector<1x64xf32> to vector<64xf32>
    %188 = vector.shape_cast %187 : vector<64xf32> to vector<1x1x64xf32>
    %189 = vector.broadcast %188 : vector<1x1x64xf32> to vector<8x16x64xf32>
    %190 = arith.mulf %185, %189 : vector<8x16x64xf32>
    %191 = arith.addf %184, %190 : vector<8x16x64xf32>
    %192 = vector.extract_strided_slice %132 {offsets = [2, 0, 0], sizes = [8, 16, 64], strides = [1, 1, 1]} : vector<10x16x64xf32> to vector<8x16x64xf32>
    %193 = vector.extract_strided_slice %26 {offsets = [8, 0], sizes = [1, 64], strides = [1, 1]} : vector<9x64xf32> to vector<1x64xf32>
    %194 = vector.shape_cast %193 : vector<1x64xf32> to vector<64xf32>
    %195 = vector.shape_cast %194 : vector<64xf32> to vector<1x1x64xf32>
    %196 = vector.broadcast %195 : vector<1x1x64xf32> to vector<8x16x64xf32>
    %197 = arith.mulf %192, %196 : vector<8x16x64xf32>
    %198 = arith.addf %191, %197 : vector<8x16x64xf32>
    %cst_38 = arith.constant 5.000000e-01 : f32
    %199 = vector.broadcast %cst_38 : f32 to vector<8x16x64xf32>
    %200 = arith.mulf %199, %112 : vector<8x16x64xf32>
    %cst_39 = arith.constant 4.471500e-02 : f32
    %201 = vector.broadcast %cst_39 : f32 to vector<8x16x64xf32>
    %202 = arith.mulf %201, %112 : vector<8x16x64xf32>
    %203 = arith.mulf %202, %112 : vector<8x16x64xf32>
    %204 = arith.mulf %203, %112 : vector<8x16x64xf32>
    %205 = arith.addf %112, %204 : vector<8x16x64xf32>
    %cst_40 = arith.constant 0.797884583 : f32
    %206 = vector.broadcast %cst_40 : f32 to vector<8x16x64xf32>
    %207 = arith.mulf %206, %205 : vector<8x16x64xf32>
    %208 = math.tanh %207 : vector<8x16x64xf32>
    %cst_41 = arith.constant 1.000000e+00 : f32
    %209 = vector.broadcast %cst_41 : f32 to vector<8x16x64xf32>
    %210 = arith.addf %209, %208 : vector<8x16x64xf32>
    %211 = arith.mulf %200, %210 : vector<8x16x64xf32>
    %212 = arith.mulf %211, %198 : vector<8x16x64xf32>
    %213 = vector.shape_cast %212 : vector<8x16x64xf32> to vector<128x64xf32>
    %c0_42 = arith.constant 0 : index
    %c0_43 = arith.constant 0 : index
    %214 = vector.load %arg13[%c0_42, %c0_43] : memref<64x128xf32, #tpu.memory_space<vmem>>, vector<64x128xf32>
    %cst_44 = arith.constant dense<0.000000e+00> : vector<128x128xf32>
    %215 = tpu.matmul %213, %214, %cst_44 {dimension_numbers = #tpu.dot_dimension_numbers<[1], [0], [0], [1], [0, 0, 1, 1], [], []>} : vector<128x64xf32>, vector<64x128xf32>, vector<128x128xf32> -> vector<128x128xf32>
    %c0_45 = arith.constant 0 : index
    %c0_46 = arith.constant 0 : index
    %216 = vector.load %arg14[%c0_45, %c0_46] : memref<1x128xf32, #tpu.memory_space<vmem>>, vector<1x128xf32>
    %217 = vector.broadcast %216 : vector<1x128xf32> to vector<128x128xf32>
    %218 = arith.addf %215, %217 : vector<128x128xf32>
    %219 = vector.shape_cast %218 : vector<128x128xf32> to vector<8x16x128xf32>
    %c0_47 = arith.constant 0 : index
    %c0_48 = arith.constant 0 : index
    %c0_49 = arith.constant 0 : index
    %c0_50 = arith.constant 0 : index
    %220 = vector.load %arg15[%c0_47, %c0_48, %c0_49, %c0_50] : memref<1x8x16x128xf32, #tpu.memory_space<vmem>>, vector<1x8x16x128xf32>
    %221 = vector.shape_cast %220 : vector<1x8x16x128xf32> to vector<8x16x128xf32>
    %222 = vector.shape_cast %219 : vector<8x16x128xf32> to vector<1x8x16x128xf32>
    tpu.vector_store %arg15[%c0_47, %c0_48, %c0_49, %c0_50], %222 {strides = array<i32>} : memref<1x8x16x128xf32, #tpu.memory_space<vmem>>, vector<1x8x16x128xf32>,
    return
  }
  func.func @transform_0(%arg0: i32, %arg1: i32) -> (i32, i32, i32, i32) {
    %c8_i32 = arith.constant 8 : i32
    %0 = arith.muli %arg1, %c8_i32 : i32
    %c1_i32 = arith.constant 1 : i32
    %1 = arith.subi %0, %c1_i32 : i32
    %c0_i32 = arith.constant 0 : i32
    %2 = arith.maxsi %1, %c0_i32 : i32
    %c0_i32_0 = arith.constant 0 : i32
    %c0_i32_1 = arith.constant 0 : i32
    %c0_i32_2 = arith.constant 0 : i32
    return %arg0, %2, %c0_i32_0, %c0_i32_1 : i32, i32, i32, i32
  }
  func.func @transform_1(%arg0: i32, %arg1: i32) -> (i32, i32, i32, i32) {
    %c0_i32 = arith.constant 0 : i32
    %c0_i32_0 = arith.constant 0 : i32
    %c0_i32_1 = arith.constant 0 : i32
    return %arg0, %arg1, %c0_i32, %c0_i32_0 : i32, i32, i32, i32
  }
  func.func @transform_2(%arg0: i32, %arg1: i32) -> (i32, i32, i32, i32) {
    %c1_i32 = arith.constant 1 : i32
    %0 = arith.addi %arg1, %c1_i32 : i32
    %c8_i32 = arith.constant 8 : i32
    %1 = arith.muli %0, %c8_i32 : i32
    %c15_i32 = arith.constant 15 : i32
    %2 = arith.minsi %1, %c15_i32 : i32
    %c0_i32 = arith.constant 0 : i32
    %c0_i32_0 = arith.constant 0 : i32
    %c0_i32_1 = arith.constant 0 : i32
    return %arg0, %2, %c0_i32, %c0_i32_0 : i32, i32, i32, i32
  }
  func.func @transform_3(%arg0: i32, %arg1: i32) -> (i32, i32) {
    %c0_i32 = arith.constant 0 : i32
    %c0_i32_0 = arith.constant 0 : i32
    %c0_i32_1 = arith.constant 0 : i32
    return %c0_i32, %c0_i32_0 : i32, i32
  }
  func.func @transform_4(%arg0: i32, %arg1: i32) -> (i32, i32) {
    %c0_i32 = arith.constant 0 : i32
    %c0_i32_0 = arith.constant 0 : i32
    %c0_i32_1 = arith.constant 0 : i32
    return %c0_i32, %c0_i32_0 : i32, i32
  }
  func.func @transform_5(%arg0: i32, %arg1: i32) -> (i32, i32) {
    %c0_i32 = arith.constant 0 : i32
    %c0_i32_0 = arith.constant 0 : i32
    %c0_i32_1 = arith.constant 0 : i32
    return %c0_i32, %c0_i32_0 : i32, i32
  }
  func.func @transform_6(%arg0: i32, %arg1: i32) -> (i32, i32) {
    %c0_i32 = arith.constant 0 : i32
    %c0_i32_0 = arith.constant 0 : i32
    %c0_i32_1 = arith.constant 0 : i32
    return %c0_i32, %c0_i32_0 : i32, i32
  }
  func.func @transform_7(%arg0: i32, %arg1: i32) -> (i32, i32) {
    %c0_i32 = arith.constant 0 : i32
    %c0_i32_0 = arith.constant 0 : i32
    %c0_i32_1 = arith.constant 0 : i32
    return %c0_i32, %c0_i32_0 : i32, i32
  }
  func.func @transform_8(%arg0: i32, %arg1: i32) -> (i32, i32) {
    %c0_i32 = arith.constant 0 : i32
    %c0_i32_0 = arith.constant 0 : i32
    %c0_i32_1 = arith.constant 0 : i32
    return %c0_i32, %c0_i32_0 : i32, i32
  }
  func.func @transform_9(%arg0: i32, %arg1: i32) -> (i32, i32) {
    %c0_i32 = arith.constant 0 : i32
    %c0_i32_0 = arith.constant 0 : i32
    %c0_i32_1 = arith.constant 0 : i32
    return %c0_i32, %c0_i32_0 : i32, i32
  }
  func.func @transform_10(%arg0: i32, %arg1: i32) -> (i32, i32) {
    %c0_i32 = arith.constant 0 : i32
    %c0_i32_0 = arith.constant 0 : i32
    %c0_i32_1 = arith.constant 0 : i32
    return %c0_i32, %c0_i32_0 : i32, i32
  }
  func.func @transform_11(%arg0: i32, %arg1: i32) -> (i32, i32) {
    %c0_i32 = arith.constant 0 : i32
    %c0_i32_0 = arith.constant 0 : i32
    %c0_i32_1 = arith.constant 0 : i32
    return %c0_i32, %c0_i32_0 : i32, i32
  }
  func.func @transform_12(%arg0: i32, %arg1: i32) -> (i32, i32) {
    %c0_i32 = arith.constant 0 : i32
    %c0_i32_0 = arith.constant 0 : i32
    %c0_i32_1 = arith.constant 0 : i32
    return %c0_i32, %c0_i32_0 : i32, i32
  }
  func.func @transform_13(%arg0: i32, %arg1: i32) -> (i32, i32, i32, i32) {
    %c0_i32 = arith.constant 0 : i32
    %c0_i32_0 = arith.constant 0 : i32
    %c0_i32_1 = arith.constant 0 : i32
    return %arg0, %arg1, %c0_i32, %c0_i32_0 : i32, i32, i32, i32
  }
}

</mosaic_0001>

<bundles_post_ra>
// kernel: squeeze.4
= control target key start
LH: loop header
LB: loop body
LE: loop exit
PB: predicated region body
PF: predicated region fallthrough
CT: control target
= control target key end

     0   :  { %s59_s0 = inlined_call_operand.vmem [shape: f32[128,3,3], index: 0, kind: input, shape index: {}]   ;;  %s60_s1 = inlined_call_operand.vmem [shape: f32[128,9], index: 1, kind: output, shape index: {}]  }
   0x1   :  { %v27_v0 = vld [vmem:[%s59_s0 + $0x8] sm:$0xf]  ;;  %v28_v1 = vld [vmem:[%s59_s0 + $0x4] sm:$0xf]  ;;  %v14_v2 = vld [vmem:[%s59_s0] sm:$0xf] }
   0x2   :  { %9 = vst [vmem:[#allocation0] sm:$0xf] %v27_v0  ;;  %13 = vst [vmem:[#allocation0 + $0x10] sm:$0xf] %v28_v1 }
   0x3   :  { %15 = vst [vmem:[#allocation0 + $0x8] sm:$0xf] %v14_v2 }
   0x9   :  { %v19_v4 = vld [vmem:[#allocation0 + $0x10] sm:$0x7]   ;;  %v23_v5 = vld [vmem:[#allocation0] sm:$0x7]  }
   0xa   :  { %v16_v3 = vld [vmem:[#allocation0 + $0x8] sm:$0x7]   ;;  %29 = vst [vmem:[%s60_s1 + $0x3] sm:$0x7] %v19_v4   ;;  %30 = vst [vmem:[%s60_s1 + $0x6] sm:$0x7] %v23_v5  }
   0xb   :  { %17 = vst [vmem:[%s60_s1] sm:$0x7] %v16_v3  }

// kernel: feedforward_restormer.1
= control target key start
LH: loop header
LB: loop body
LE: loop exit
PB: predicated region body
PF: predicated region fallthrough
CT: control target
= control target key end

     0   :  { %s3144_s25 = smov 0   ;;  %s3146_s26 = smov 0   ;;  %s5214_s0 = inlined_call_operand.vmem [shape: f32[2,16,16,32], index: 0, kind: input, shape index: {}, may-alias: {0,1,2}]   ;;  %s5215_s1 = inlined_call_operand.vmem [shape: f32[2,16,16,32], index: 1, kind: input, shape index: {}, may-alias: {0,1,2}]   ;;  %s5216_s2 = inlined_call_operand.vmem [shape: f32[2,16,16,32], index: 2, kind: input, shape index: {}, may-alias: {0,1,2}]   ;;  %s5217_s3 = inlined_call_operand.vmem [shape: f32[32,64], index: 3, kind: input, shape index: {}]   ;;  %s5218_s4 = inlined_call_operand.vmem [shape: f32[1,64], index: 4, kind: input, shape index: {}]   ;;  %s5219_s5 = inlined_call_operand.vmem [shape: f32[32,64], index: 5, kind: input, shape index: {}]   ;;  %s5220_s6 = inlined_call_operand.vmem [shape: f32[1,64], index: 6, kind: input, shape index: {}]   ;;  %s5221_s7 = inlined_call_operand.vmem [shape: f32[9,64], index: 7, kind: input, shape index: {}]   ;;  %s5222_s8 = inlined_call_operand.vmem [shape: f32[1,64], index: 8, kind: input, shape index: {}]   ;;  %s5223_s9 = inlined_call_operand.vmem [shape: f32[9,64], index: 9, kind: input, shape index: {}]   ;;  %s5224_s10 = inlined_call_operand.vmem [shape: f32[1,64], index: 10, kind: input, shape index: {}]   ;;  %s5225_s11 = inlined_call_operand.vmem [shape: f32[64,128], index: 11, kind: input, shape index: {}]   ;;  %s5226_s12 = inlined_call_operand.vmem [shape: f32[1,128], index: 12, kind: input, shape index: {}]   ;;  %s5227_s13 = inlined_call_operand.vmem [shape: f32[2,16,16,128], index: 13, kind: output, shape index: {}]  }
   0x1   :  { %5301 = sst [smem:[#allocation86_spill]] %s5215_s1  ;;  %s3148_s27 = smov 0  }
   0x2   :  { %5302 = sst [smem:[#allocation87_spill]] %s5217_s3  ;;  %s3150_s28 = smov 0  }
   0x3   :  { %s3152_s29 = smov 0  }
   0x4 LB: > { %s32_s30 = sadd.s32 1, %s3064_s27  ;;  %s35_s14 = sadd.s32 1, %s3068_s28  ;;  %s3072_s29 = sphi %s3152_s29, %s23_s29   ;;  %s3068_s28 = sphi %s3150_s28, %s5598_s28   ;;  %s3064_s27 = sphi %s3148_s27, %s5597_s27   ;;  %s3060_s26 = sphi %s3146_s26, %s5596_s26   ;;  %s3056_s25 = sphi %s3144_s25, %s5595_s25  }
   0x5   : > { %p33_p0 = scmp.ge.s32.totalorder %s32_s30, 2  ;;  %p2667_p1 = scmp.ge.s32.totalorder %s3072_s29, 1 }
   0x6   : > { %p473_p2 = scmp.lt.s32.totalorder %s3072_s29, 5 }
   0x7   : > { %s5600_s30 = smov (%p33_p0, %s32_s30), 0  ;;  %s5602_s14 = smov (!%p33_p0, %s35_s14), %s3068_s28 }
   0x8   : > { %p474_p3 = pnand %p2667_p1, %p473_p2  ;;  %p37_p4 = scmp.ge.s32.totalorder %s5602_s14, 2 }
   0xa   : > { %s5604_s14 = smov (%p37_p4, %s5602_s14), 0  ;;  %477 = sbr.rel (%p474_p3) target bundleno = 698 (0x2ba), region = 72 }
   0xb   : > { %5303 = sst [smem:[#allocation2_spill]] %s5604_s14 }
   0xf   : > { %s5304_s3 = sld [smem:[#allocation87_spill]]  ;;  %s3183_s19 = sshll.u32 %s3056_s25, 3  ;;  %v1487_v4 = vld [vmem:[%s5219_s5 + $0x18] sm:$0xff]  ;;  %vm777_vm0 = vcmask 261120   ;;  %v1486_v8 = vld [vmem:[%s5219_s5 + $0x10] sm:$0xff]  ;;  %v1485_v10 = vld [vmem:[%s5219_s5 + $0x8] sm:$0xff]  ;;  %v629_v28 = vlaneseq }
  0x10   : > { %p557_p5 = scmp.lt.s32.totalorder %s3060_s26, 1  ;;  %p573_p6 = scmp.lt.s32.totalorder %s3183_s19, 15  ;;  %v1484_v12 = vld [vmem:[%s5219_s5] sm:$0xff]  ;;  %vm2306_vm7 = vcmask 523264  }
  0x11   : > { %s3187_s20 = sadd.s32 4294967295, %s3183_s19  ;;  %s5306_s1 = sld [smem:[#allocation86_spill]]  ;;  %v3317_v29 = vshrl.u32 %v629_v28, 7  ;;  %v3322_v30 = vld [vmem:[%s5218_s4] ss:$0 sm:$0xff] }
  0x12   : > { %s5606_s26 = smov (!%p557_p5, %s3060_s26), 1  ;;  %p555_p7 = scmp.gt.s32.totalorder %s3187_s20, 0  ;;  %v762_v38 = vld [vmem:[%s5221_s7] sm:$0xff] }
  0x13   : > { %s574_s23 = scalar_select %p573_p6, %s3183_s19, 15  ;;  %v1156_v32 = vsub.s32 0, %v3317_v29  ;;  %v1198_v35 = vsub.s32 1, %v3317_v29  ;;  %v1306_v36 = vsub.s32 4, %v3317_v29  ;;  %v1414_v37 = vsub.s32 7, %v3317_v29 }
  0x14   : > { %s3196_s16 = sshll.u32 %s5606_s26, 5  ;;  %p2670_p8 = scmp.lt.s32.totalorder %s3187_s20, 15  ;;  %vm1043_vm1 = vcmp.lt.s32.totalorder %v3317_v29, 1  ;;  %vm1108_vm2 = vcmp.lt.s32.totalorder %v3317_v29, 7  ;;  %v1234_v42 = vsub.s32 2, %v3317_v29  ;;  %v1270_v43 = vsub.s32 3, %v3317_v29 }
  0x15   : > { %v769_v0 = vld [vmem:[%s5304_s3 + $0x18] sm:$0xff]  ;;  %v768_v1 = vld [vmem:[%s5304_s3 + $0x10] sm:$0xff]  ;;  %v767_v2 = vld [vmem:[%s5304_s3 + $0x8] sm:$0xff]  ;;  %s2679_s17 = sshll.u32 %s574_s23, 1  ;;  %s2765_s26 = sadd.s32 8, %s3183_s19  ;;  %v3344_v41 = vrot.slane %v762_v38, %v1156_v32  ;;  %v1342_v44 = vsub.s32 5, %v3317_v29  ;;  %v3354_v49 = vrot.slane %v762_v38, %v1198_v35  ;;  %v3358_v50 = vrot.slane %v762_v38, %v1306_v36 }
  0x16   : > { %2954 = vmatprep.subr.mxu1 %v769_v0  ;;  %2838 = vmatprep.subr.mxu0 %v769_v0  ;;  %v766_v3 = vld [vmem:[%s5304_s3] sm:$0xff]  ;;  %s3201_s18 = sadd.s32 %s2679_s17, %s3196_s16  ;;  %p3208_p9 = scmp.lt.s32.totalorder %s2765_s26, 15  ;;  %v3362_v51 = vrot.slane %v762_v38, %v1414_v37  ;;  %v1378_v57 = vsub.s32 6, %v3317_v29  ;;  %v3388_v61 = vrot.slane %v762_v38, %v1234_v42  ;;  %v3390_v62 = vrot.slane %v762_v38, %v1270_v43 }
  0x17   : > { %2958 = vmatpush3.msra.mxu1 %v769_v0  ;;  %2839 = vmatpush3.msra.mxu0 %v769_v0  ;;  %s5228_s24 = sshll.u32 %s3201_s18, 3  ;;  %p670_p10 = scmp.eq.s32.totalorder %s3056_s25, 0  ;;  %v3380_v56 = vld [vmem:[%s5222_s8] ss:$0 sm:$0xff]  ;;  %v3393_v63 = vadd.s32 8, %v3317_v29  ;;  %v3399_v0 = vrot.slane %v762_v38, %v1342_v44  ;;  %vm758_vm4 = vcmp.eq.s32.totalorder %v3317_v29, 0 }
  0x18   : > { %2955 = vmatprep.subr.mxu1 %v768_v1  ;;  %2840 = vmatprep.subr.mxu0 %v768_v1  ;;  %s3217_s21 = scalar_lea.vmem %s5306_s1, %s5228_s24  ;;  %s5608_s26 = smov (!%p3208_p9, %s2765_s26), 15 }
  0x19   : > { %2959 = vmatpush3.msra.mxu1 %v768_v1  ;;  %2841 = vmatpush3.msra.mxu0 %v768_v1  ;;  %v3220_v5 = vld [vmem:[%s3217_s21 + $0x50] sm:$0xff]  ;;  %v3223_v6 = vld [vmem:[%s3217_s21 + $0x58] sm:$0xff]  ;;  %s556_s19 = scalar_select %p555_p7, %s3187_s20, 0  ;;  %v3229_v7 = vld [vmem:[%s3217_s21 + $0x60] sm:$0xff]  ;;  %5308 = vst [vmem:[#allocation4_spill] sm:$0xff] %v3393_v63  ;;  %vm761_vm5 = vcmp.eq.s32.totalorder %v3393_v63, 15 }
  0x1a   : > { %2956 = vmatprep.subr.mxu1 %v767_v2  ;;  %2842 = vmatprep.subr.mxu0 %v767_v2  ;;  %v3245_v9 = vld [vmem:[%s3217_s21 + $0x68] sm:$0xff]  ;;  %s5612_s26 = smov (!%p3208_p9, %s5608_s26), 15  ;;  %v625_v11 = vld [vmem:[%s3217_s21 + $0x70] sm:$0xff]  ;;  %v626_v13 = vld [vmem:[%s3217_s21 + $0x78] sm:$0xff]  ;;  %p714_p11 = scmp.eq.s32.totalorder %s3056_s25, 1 }
  0x1b   : > { %2960 = vmatpush3.msra.mxu1 %v767_v2  ;;  %2843 = vmatpush3.msra.mxu0 %v767_v2  ;;  %s5610_s19 = smov (!%p2670_p8, %s556_s19), 15  ;;  %s2686_s15 = sshll.u32 %s5612_s26, 1  ;;  %v611_v16 = vld [vmem:[%s3217_s21] sm:$0xff]  ;;  %v612_v18 = vld [vmem:[%s3217_s21 + $0x8] sm:$0xff]  ;;  %v613_v20 = vld [vmem:[%s3217_s21 + $0x10] sm:$0xff] }
  0x1c   : > { %2957 = vmatprep.subr.mxu1 %v766_v3  ;;  %2844 = vmatprep.subr.mxu0 %v766_v3  ;;  %s2675_s22 = sshll.u32 %s5610_s19, 1  ;;  %s591_s24 = sadd.s32 %s2686_s15, %s3196_s16  ;;  %v614_v21 = vld [vmem:[%s3217_s21 + $0x18] sm:$0xff]  ;;  %v615_v22 = vld [vmem:[%s3217_s21 + $0x20] sm:$0xff]  ;;  %v616_v23 = vld [vmem:[%s3217_s21 + $0x28] sm:$0xff] }
  0x1d   : > { %2961 = vmatpush3.msra.mxu1 %v766_v3  ;;  %2845 = vmatpush3.msra.mxu0 %v766_v3  ;;  %s563_s20 = sadd.s32 %s3196_s16, %s2675_s22  ;;  %s2688_s26 = sshll.u32 %s591_s24, 3  ;;  %v617_v24 = vld [vmem:[%s3217_s21 + $0x30] sm:$0xff]  ;;  %v618_v25 = vld [vmem:[%s3217_s21 + $0x38] sm:$0xff]  ;;  %v619_v26 = vld [vmem:[%s3217_s21 + $0x40] sm:$0xff] }
  0x1e   : > { %2876 = vmatprep.subr.mxu1 %v1487_v4  ;;  %2864 = vmatprep.mubr.msk.f32.mxu1 %vm777_vm0, %v3220_v5  ;;  %s2677_s14 = sshll.u32 %s563_s20, 3  ;;  %s593_s22 = scalar_lea.vmem %s5216_s2, %s2688_s26  ;;  %v620_v27 = vld [vmem:[%s3217_s21 + $0x48] sm:$0xff] }
  0x1f   : > { %2865 = vmatmul.mubr.msk.f32.vlgmr.msra.gmra.mxu1 %vm777_vm0, %v3223_v6  ;;  %s565_s19 = scalar_lea.vmem %s5214_s0, %s2677_s14  ;;  %v627_v17 = vld [vmem:[%s593_s22] sm:$0xff]  ;;  %v628_v19 = vld [vmem:[%s593_s22 + $0x8] sm:$0xff]  ;;  %s5593_s25 = sshll.u32 %s3201_s18, 3 }
  0x20   : > { %2877 = vmatpush3.msra.mxu1 %v1487_v4  ;;  %2867 = vmatprep.mubr.msk.f32.mxu1 %vm777_vm0, %v3229_v7  ;;  %v609_v14 = vld [vmem:[%s565_s19] sm:$0xff]  ;;  %v610_v15 = vld [vmem:[%s565_s19 + $0x8] sm:$0xff]  ;;  %s3332_s21 = scalar_select %p670_p10, 1, 0 }
  0x21   : > { %2878 = vmatprep.subr.mxu1 %v1486_v8  ;;  %2846 = vmatprep.mubr.msk.f32.mxu0 %vm777_vm0, %v609_v14  ;;  %s3397_s23 = scalar_select %p714_p11, 1, 0 }
  0x22   : > { %2879 = vmatpush3.msra.mxu1 %v1486_v8  ;;  %2847 = vmatmul.mubr.msk.f32.vlgmr.msra.gmra.mxu0 %vm777_vm0, %v610_v15  ;;  %v672_v52 = vstv %s3332_s21  ;;  %v764_v8 = vld [vmem:[%s5223_s9] sm:$0xff]  ;;  %s5181_s1 = scalar_lea.vmem %s5227_s13, %s5593_s25 }
  0x23   : > { %2868 = vmatmul.mubr.msk.f32.gmra.mxu1 %vm777_vm0, %v3245_v9  ;;  %2880 = vmatprep.subr.mxu1 %v1485_v10  ;;  %vm3401_vm3 = vcmp.eq.s32.totalorder %v672_v52, 1  ;;  %v3461_v28 = vrot.slane %v764_v8, %v1234_v42 }
  0x24   : > { %2870 = vmatprep.mubr.msk.f32.mxu1 %vm777_vm0, %v625_v11  ;;  %2881 = vmatpush3.msra.mxu1 %v1485_v10 }
  0x25   : > { %2882 = vmatprep.subr.mxu1 %v1484_v12  ;;  %2849 = vmatprep.mubr.msk.f32.mxu0 %vm777_vm0, %v611_v16  ;;  %5312 = vst [vmem:[#allocation6_spill] sm:$0xff] %v3461_v28 }
  0x26   : > { %2883 = vmatpush3.msra.mxu1 %v1484_v12  ;;  %2850 = vmatmul.mubr.msk.f32.gmra.mxu0 %vm777_vm0, %v612_v18 }
  0x27   : > { %2871 = vmatmul.mubr.msk.f32.gmra.mxu1 %vm777_vm0, %v626_v13  ;;  %2852 = vmatprep.mubr.msk.f32.mxu0 %vm777_vm0, %v613_v20 }
  0x28   : > { %2873 = vmatprep.mubr.msk.f32.mxu1 %vm777_vm0, %v627_v17 }
  0x2a   : > { %2853 = vmatmul.mubr.msk.f32.gmra.mxu0 %vm777_vm0, %v614_v21 }
  0x2b   : > { %2874 = vmatmul.mubr.msk.f32.gmra.mxu1 %vm777_vm0, %v628_v19  ;;  %2855 = vmatprep.mubr.msk.f32.mxu0 %vm777_vm0, %v615_v22 }
  0x2c   : > { %2884 = vmatprep.mubr.msk.f32.mxu1 %vm777_vm0, %v609_v14  ;;  %v3421_v14 = vrot.slane %v762_v38, %v1378_v57  ;;  %v3475_v38 = vrot.slane %v764_v8, %v1342_v44  ;;  %v3490_v44 = vrot.slane %v764_v8, %v1414_v37 }
  0x2e   : > { %2856 = vmatmul.mubr.msk.f32.gmra.mxu0 %vm777_vm0, %v616_v23  ;;  %5315 = vst [vmem:[#allocation9_spill] sm:$0xff] %v3475_v38  ;;  %5317 = vst [vmem:[#allocation11_spill] sm:$0xff] %v3490_v44 }
  0x2f   : > { %2885 = vmatmul.mubr.msk.f32.vlgmr.msra.gmra.mxu1 %vm777_vm0, %v610_v15  ;;  %2858 = vmatprep.mubr.msk.f32.mxu0 %vm777_vm0, %v617_v24 }
  0x30   : > { %2887 = vmatprep.mubr.msk.f32.mxu1 %vm777_vm0, %v611_v16 }
  0x32   : > { %2859 = vmatmul.mubr.msk.f32.gmra.mxu0 %vm777_vm0, %v618_v25 }
  0x33   : > { %2888 = vmatmul.mubr.msk.f32.gmra.mxu1 %vm777_vm0, %v612_v18  ;;  %2861 = vmatprep.mubr.msk.f32.mxu0 %vm777_vm0, %v619_v26 }
  0x34   : > { %2890 = vmatprep.mubr.msk.f32.mxu1 %vm777_vm0, %v613_v20 }
  0x36   : > { %2862 = vmatmul.mubr.msk.f32.gmra.mxu0 %vm777_vm0, %v620_v27 }
  0x37   : > { %2891 = vmatmul.mubr.msk.f32.gmra.mxu1 %vm777_vm0, %v614_v21 }
  0x38   : > { %2893 = vmatprep.mubr.msk.f32.mxu1 %vm777_vm0, %v615_v22 }
  0x3b   : > { %2894 = vmatmul.mubr.msk.f32.gmra.mxu1 %vm777_vm0, %v616_v23 }
  0x3c   : > { %2896 = vmatprep.mubr.msk.f32.mxu1 %vm777_vm0, %v617_v24  ;;  %v3455_v24 = vrot.slane %v764_v8, %v1156_v32 }
  0x3e   : > { %5311 = vst [vmem:[#allocation5_spill] sm:$0xff] %v3455_v24 }
  0x3f   : > { %2897 = vmatmul.mubr.msk.f32.gmra.mxu1 %vm777_vm0, %v618_v25 }
  0x40   : > { %2899 = vmatprep.mubr.msk.f32.mxu1 %vm777_vm0, %v619_v26 }
  0x43   : > { %2900 = vmatmul.mubr.msk.f32.gmra.mxu1 %vm777_vm0, %v620_v27 }
  0x44   : > { %2902 = vmatprep.mubr.msk.f32.mxu1 %vm777_vm0, %v3220_v5 }
  0x47   : > { %2903 = vmatmul.mubr.msk.f32.gmra.mxu1 %vm777_vm0, %v3223_v6 }
  0x48   : > { %2905 = vmatprep.mubr.msk.f32.mxu1 %vm777_vm0, %v3229_v7 }
  0x4b   : > { %2906 = vmatmul.mubr.msk.f32.gmra.mxu1 %vm777_vm0, %v3245_v9 }
  0x4c   : > { %2908 = vmatprep.mubr.msk.f32.mxu1 %vm777_vm0, %v625_v11 }
  0x4f   : > { %2909 = vmatmul.mubr.msk.f32.gmra.mxu1 %vm777_vm0, %v626_v13 }
  0x50   : > { %2911 = vmatprep.mubr.msk.f32.mxu1 %vm777_vm0, %v627_v17 }
  0x53   : > { %2912 = vmatmul.mubr.msk.f32.gmra.mxu1 %vm777_vm0, %v628_v19  ;;  %v3439_v19 = vrot.slane %v764_v8, %v1198_v35  ;;  %v3473_v35 = vrot.slane %v764_v8, %v1270_v43 }
  0x55   : > { %5314 = vst [vmem:[#allocation8_spill] sm:$0xff] %v3473_v35 }
  0xdf   : > { %v2866_v31 = vpop.f32.mrf.mxu1 }
  0xe0   : > { %v3327_v33 = vadd.f32 %v2866_v31, %v3322_v30  ;;  %v3465_v31 = vrot.slane %v764_v8, %v1306_v36 }
  0xe1   : > { %v964_v34 = vpop.f32.mrf.mxu1 }
  0xe2   : > { %v3338_v39 = vadd.f32 %v3322_v30, %v964_v34  ;;  %v1036_v45 = vrot.slane %v3327_v33, 7  ;;  %v1101_v46 = vrot.slane %v3327_v33, 1  ;;  %v2848_v58 = vpop.f32.mrf.mxu0  ;;  %v1213_v4 = vmul.f32 %v3354_v49, %v3327_v33  ;;  %5313 = vst [vmem:[#allocation7_spill] sm:$0xff] %v3465_v31 }
  0xe3   : > { %v2869_v40 = vpop.f32.mrf.mxu1  ;;  %v910_v6 = vadd.f32 %v2848_v58, %v3322_v30  ;;  %v3496_v58 = vmul.f32 %v3362_v51, %v3327_v33 }
  0xe4   : > { %5307 = vst [vmem:[#allocation3_spill] sm:$0xff] %v3338_v39  ;;  %v5230_v47 = vrot.slane %v3338_v39, 7  ;;  %v5229_v48 = vrot.slane %v3338_v39, 1  ;;  %v3384_v59 = vadd.f32 %v2869_v40, %v3322_v30  ;;  %v904_v2 = vpop.f32.mrf.mxu0  ;;  %v3508_v37 = vmul.f32 %v3362_v51, %v3338_v39 }
  0xe5   : > { %v974_v53 = vpop.f32.mrf.mxu1  ;;  %v905_v7 = vadd.f32 %v3322_v30, %v904_v2  ;;  %v3443_v20 = vsel %vm3401_vm3, 0.0, %v910_v6  ;;  %5319 = vst [vmem:[#allocation13_spill] sm:$0xff] %v3496_v58  ;;  %v3504_v2 = vmul.f32 %v3358_v50, %v3338_v39 }
  0xe6   : > { %v3369_v54 = vsel %vm1043_vm1, %v5230_v47, %v1036_v45  ;;  %v3375_v55 = vsel %vm1108_vm2, %v5229_v48, %v1101_v46  ;;  %v3407_v3 = vadd.f32 %v3322_v30, %v974_v53  ;;  %v5233_v9 = vrot.slane %v3384_v59, 7  ;;  %v2851_v27 = vpop.f32.mrf.mxu0  ;;  %5322 = vst [vmem:[#allocation16_spill] sm:$0xff] %v3508_v37 }
  0xe7   : > { %v1171_v60 = vmul.f32 %v3344_v41, %v3369_v54  ;;  %v5232_v10 = vrot.slane %v3384_v59, 1  ;;  %v3447_v21 = vsel %vm3401_vm3, 0.0, %v905_v7  ;;  %v2872_v23 = vpop.f32.mrf.mxu1  ;;  %v1024_v40 = vrot.slane %v3443_v20, 7  ;;  %5321 = vst [vmem:[#allocation15_spill] sm:$0xff] %v3504_v2 }
  0xe8   : > { %v1037_v11 = vrot.slane %v3407_v3, 7  ;;  %v1102_v12 = vrot.slane %v3407_v3, 1  ;;  %v1214_v32 = vmul.f32 %v3354_v49, %v3407_v3  ;;  %v5231_v42 = vrot.slane %v3447_v21, 7 }
  0xe9   : > { %v1193_v5 = vadd.f32 %v3380_v56, %v1171_v60  ;;  %v984_v43 = vpop.f32.mrf.mxu1  ;;  %v3492_v53 = vrot.slane %v764_v8, %v1378_v57  ;;  %v3500_v60 = vmul.f32 %v3354_v49, %v3338_v39  ;;  %v1215_v57 = vmul.f32 %v3354_v49, %v3384_v59 }
  0xea   : > { %v3429_v16 = vsel %vm1043_vm1, %v1037_v11, %v5233_v9  ;;  %v1049_v17 = vsel %vm1043_vm1, %v1036_v45, %v1037_v11  ;;  %v3437_v18 = vsel %vm1108_vm2, %v1102_v12, %v5232_v10  ;;  %v1114_v25 = vsel %vm1108_vm2, %v1101_v46, %v1102_v12 }
  0xeb   : > { %v1229_v13 = vadd.f32 %v1213_v4, %v1193_v5  ;;  %v3451_v22 = vsel %vm758_vm4, 0.0, %v1049_v17  ;;  %v3469_v34 = vsel %vm761_vm5, 0.0, %v1114_v25  ;;  %v1173_v45 = vmul.f32 %v3344_v41, %v3429_v16  ;;  %5318 = vst [vmem:[#allocation12_spill] sm:$0xff] %v3492_v53  ;;  %5320 = vst [vmem:[#allocation14_spill] sm:$0xff] %v3500_v60  ;;  %v914_v5 = vpop.f32.mrf.mxu0 }
  0xec   : > { %v1172_v26 = vmul.f32 %v3344_v41, %v3451_v22  ;;  %v3484_v46 = vmul.f32 %v3358_v50, %v3327_v33  ;;  %v1249_v52 = vmul.f32 %v3388_v61, %v3469_v34  ;;  %v1285_v33 = vmul.f32 %v3390_v62, %v3429_v16 }
  0xed   : > { %v1321_v7 = vmul.f32 %v3358_v50, %v3384_v59  ;;  %v1062_v8 = vsel %vm1043_vm1, %v5231_v42, %v1024_v40  ;;  %v1195_v11 = vadd.f32 %v3380_v56, %v1173_v45  ;;  %v3522_v12 = vadd.f32 %v3322_v30, %v984_v43 }
  0xee   : > { %v1194_v36 = vadd.f32 %v3380_v56, %v1172_v26  ;;  %5316 = vst [vmem:[#allocation10_spill] sm:$0xff] %v3484_v46  ;;  %v1265_v6 = vadd.f32 %v1249_v52, %v1229_v13  ;;  %v1089_v17 = vrot.slane %v3443_v20, 1  ;;  %v5234_v13 = vrot.slane %v3447_v21, 1 }
  0xef   : > { %v3527_v26 = vadd.f32 %v3322_v30, %v914_v5  ;;  %v3540_v45 = vmul.f32 %v3390_v62, %v3369_v54  ;;  %v3544_v52 = vmul.f32 %v3362_v51, %v3384_v59  ;;  %v3547_v43 = vadd.f32 %v2872_v23, %v3322_v30 }
  0xf0   : > { %v1230_v4 = vadd.f32 %v1214_v32, %v1194_v36  ;;  %v1301_v25 = vadd.f32 %v1285_v33, %v1265_v6  ;;  %v3532_v32 = vld [vmem:[%s5221_s7 + $0x8] ss:$0 sm:$0xff]  ;;  %v3536_v36 = vmul.f32 %v3388_v61, %v3375_v55  ;;  %v3551_v5 = vmul.f32 %v3399_v0, %v3375_v55 }
  0xf1   : > { %5324 = vst [vmem:[#allocation18_spill] sm:$0xff] %v3540_v45  ;;  %5325 = vst [vmem:[#allocation19_spill] sm:$0xff] %v3544_v52  ;;  %v1127_v6 = vsel %vm1108_vm2, %v5234_v13, %v1089_v17  ;;  %v1159_v33 = vmul.f32 %v3344_v41, %v1062_v8  ;;  %v1025_v48 = vrot.slane %v3527_v26, 7  ;;  %v3561_v47 = vmul.f32 %v3421_v14, %v3369_v54 }
  0xf2   : > { %5323 = vst [vmem:[#allocation17_spill] sm:$0xff] %v3536_v36  ;;  %5326 = vst [vmem:[#allocation20_spill] sm:$0xff] %v3551_v5  ;;  %v1090_v23 = vrot.slane %v3527_v26, 1  ;;  %v1039_v42 = vrot.slane %v3522_v12, 7  ;;  %v1231_v10 = vadd.f32 %v1215_v57, %v1195_v11  ;;  %v3567_v9 = vmul.f32 %v3532_v32, %v3375_v55 }
  0xf3   : > { %5327 = vst [vmem:[#allocation21_spill] sm:$0xff] %v3561_v47  ;;  %v1201_v13 = vmul.f32 %v3354_v49, %v3443_v20  ;;  %v3572_v8 = vadd.f32 %v2851_v27, %v3322_v30  ;;  %v1104_v15 = vrot.slane %v3522_v12, 1  ;;  %v3577_v54 = vmul.f32 %v3354_v49, %v3447_v21 }
  0xf4   : > { %5328 = vst [vmem:[#allocation22_spill] sm:$0xff] %v3567_v9  ;;  %v3580_v52 = vmul.f32 %v3388_v61, %v1127_v6  ;;  %v3584_v57 = vmul.f32 %v3390_v62, %v3451_v22  ;;  %v5238_v55 = vrot.slane %v3547_v43, 7  ;;  %v1181_v20 = vadd.f32 %v3380_v56, %v1159_v33 }
  0xf5   : > { %v3590_v27 = vmul.f32 %v3358_v50, %v3407_v3  ;;  %v1061_v58 = vsel %vm1043_vm1, %v1024_v40, %v1025_v48  ;;  %v5331_v53 = vstv %s3397_s23  ;;  %v5332_v6 = vmov 0 }
  0xf6   : > { %5329 = vst [vmem:[#allocation23_spill] sm:$0xff] %v3584_v57  ;;  %vm3597_vm6 = vcmp.eq.s32.totalorder %v5331_v53, 1  ;;  %v1126_v44 = vsel %vm1108_vm2, %v1089_v17, %v1090_v23  ;;  %v1046_v33 = vsel %vm1043_vm1, %v1039_v42, %v5238_v55  ;;  %v5335_v38 = vrot.slane %v3384_v59, 7 }
  0xf7   : > { %5330 = vst [vmem:[#allocation24_spill] sm:$0xff] %v3590_v27  ;;  %v5333_v6 = vsel %vm3597_vm6, 4294967295, %v5332_v6  ;;  %v1250_v40 = vmul.f32 %v3388_v61, %v3437_v18  ;;  %v3615_v53 = vmul.f32 %v3399_v0, %v3469_v34  ;;  %v5337_v55 = vrot.slane %v3547_v43, 1 }
  0xf8   : > { %5334 = vst [vmem:[#allocation25_spill] sm:$0xff] %v5333_v6  ;;  %v1047_v11 = vsel %vm1043_vm1, %v5335_v38, %v1039_v42  ;;  %v1070_v38 = vsel %vm758_vm4, 0.0, %v1061_v58  ;;  %v5338_v42 = vrot.slane %v3384_v59, 1  ;;  %v1217_v37 = vadd.f32 %v1201_v13, %v1181_v20 }
  0xf9   : > { %5336 = vst [vmem:[#allocation26_spill] sm:$0xff] %v3615_v53  ;;  %v3620_v17 = vsel %vm758_vm4, 0.0, %v1047_v11  ;;  %v3626_v5 = vsel %vm1108_vm2, %v1104_v15, %v5337_v55  ;;  %v1266_v47 = vadd.f32 %v1250_v40, %v1230_v4  ;;  %v2854_v11 = vpop.f32.mrf.mxu0  ;;  %v3638_v2 = vmul.f32 %v3399_v0, %v3437_v18 }
  0xfa   : > { %v1112_v53 = vsel %vm1108_vm2, %v5338_v42, %v1104_v15  ;;  %v1286_v9 = vmul.f32 %v3390_v62, %v3620_v17  ;;  %v1134_v55 = vsel %vm761_vm5, 0.0, %v1126_v44  ;;  %v1322_v4 = vmul.f32 %v3358_v50, %v3522_v12 }
  0xfb   : > { %5339 = vst [vmem:[#allocation27_spill] sm:$0xff] %v3638_v2  ;;  %v3644_v58 = vsel %vm761_vm5, 0.0, %v1112_v53  ;;  %v1337_v40 = vadd.f32 %v1321_v7, %v1301_v25  ;;  %v5340_v20 = vrot.slane %v3572_v8, 7  ;;  %v1160_v44 = vmul.f32 %v3344_v41, %v1070_v38  ;;  %v2875_v2 = vpop.f32.mrf.mxu1  ;;  %v924_v7 = vpop.f32.mrf.mxu0 }
  0xfc   : > { %v1251_v59 = vmul.f32 %v3388_v61, %v3644_v58  ;;  %v1302_v15 = vadd.f32 %v1286_v9, %v1266_v47  ;;  %v1357_v53 = vmul.f32 %v3399_v0, %v3644_v58  ;;  %v1237_v46 = vmul.f32 %v3388_v61, %v1134_v55 }
  0xfd   : > { %v1060_v42 = vsel %vm1043_vm1, %v1025_v48, %v5340_v20  ;;  %v1287_v9 = vmul.f32 %v3390_v62, %v1046_v33  ;;  %v3664_v25 = vmul.f32 %v3421_v14, %v3451_v22  ;;  %v3668_v48 = vmul.f32 %v3421_v14, %v3429_v16 }
  0xfe   : > { %v1267_v47 = vadd.f32 %v1251_v59, %v1231_v10  ;;  %v3660_v45 = vadd.f32 %v1322_v4, %v1302_v15  ;;  %v1373_v20 = vadd.f32 %v1357_v53, %v1337_v40  ;;  %v1393_v13 = vmul.f32 %v3421_v14, %v1046_v33 }
  0xff   : > { %5341 = vst [vmem:[#allocation28_spill] sm:$0xff] %v3664_v25  ;;  %5342 = vst [vmem:[#allocation29_spill] sm:$0xff] %v3668_v48  ;;  %v1161_v27 = vmul.f32 %v3344_v41, %v1060_v42  ;;  %v1202_v10 = vmul.f32 %v3354_v49, %v3527_v26  ;;  %v1000_v59 = vadd.f32 %v2875_v2, %v3322_v30  ;;  %v5343_v15 = vrot.slane %v3572_v8, 1 }
 0x100   : > { %v3674_v55 = vadd.f32 %v1287_v9, %v1267_v47  ;;  %v1182_v16 = vadd.f32 %v3380_v56, %v1160_v44  ;;  %v3682_v4 = vadd.f32 %v1393_v13, %v1373_v20  ;;  %v3685_v33 = vadd.f32 %v3322_v30, %v924_v7 }
 0x101   : > { %v1125_v22 = vsel %vm1108_vm2, %v1090_v23, %v5343_v15  ;;  %v3689_v40 = vmul.f32 %v3362_v51, %v3407_v3  ;;  %v1253_v53 = vadd.f32 %v1237_v46, %v1217_v37  ;;  %v1273_v47 = vmul.f32 %v3390_v62, %v1060_v42 }
 0x102   : > { %v3694_v2 = vsel %vm3597_vm6, 0.0, %v1000_v59  ;;  %v3698_v23 = vmul.f32 %v3532_v32, %v3469_v34  ;;  %v3702_v13 = vmul.f32 %v3532_v32, %v3437_v18  ;;  %v1203_v46 = vmul.f32 %v3354_v49, %v3572_v8 }
 0x103   : > { %5344 = vst [vmem:[#allocation30_spill] sm:$0xff] %v3689_v40  ;;  %v5240_v44 = vrot.slane %v3694_v2, 7  ;;  %v5239_v3 = vrot.slane %v3694_v2, 1  ;;  %v1183_v37 = vadd.f32 %v3380_v56, %v1161_v27  ;;  %v1238_v42 = vmul.f32 %v3388_v61, %v1125_v22 }
 0x104   : > { %5345 = vst [vmem:[#allocation31_spill] sm:$0xff] %v3698_v23  ;;  %5346 = vst [vmem:[#allocation32_spill] sm:$0xff] %v3702_v13  ;;  %v3711_v9 = vadd.f32 %v2854_v11, %v3322_v30  ;;  %v1218_v34 = vadd.f32 %v1202_v10, %v1182_v16  ;;  %v5347_v7 = vrot.slane %v3447_v21, 7  ;;  %v5348_v20 = vrot.slane %v3447_v21, 1  ;;  %v2298_v13 = vld [vmem:[%s5225_s11 + $0x38] sm:$0xff]  ;;  %v2857_v23 = vpop.f32.mrf.mxu0 }
 0x105   : > { %v1027_v59 = vrot.slane %v3685_v33, 7  ;;  %v1309_v11 = vmul.f32 %v3358_v50, %v3572_v8  ;;  %v1323_v10 = vmul.f32 %v3358_v50, %v3547_v43  ;;  %v1289_v15 = vadd.f32 %v1273_v47, %v1253_v53  ;;  %2914 = vmatprep.subr.mxu0 %v2298_v13 }
 0x106   : > { %v1063_v18 = vsel %vm1043_vm1, %v5240_v44, %v5347_v7  ;;  %v1128_v27 = vsel %vm1108_vm2, %v5239_v3, %v5348_v20  ;;  %v994_v7 = vpop.f32.mrf.mxu1  ;;  %v3734_v21 = vmul.f32 %v3362_v51, %v3547_v43  ;;  %v3738_v20 = vmul.f32 %v3358_v50, %v3527_v26  ;;  %v2297_v26 = vld [vmem:[%s5225_s11 + $0x30] sm:$0xff]  ;;  %2915 = vmatpush3.msra.mxu0 %v2298_v13 }
 0x107   : > { %v1068_v16 = vsel %vm758_vm4, 0.0, %v1063_v18  ;;  %v1092_v44 = vrot.slane %v3685_v33, 1  ;;  %v3742_v48 = vadd.f32 %v1203_v46, %v1183_v37  ;;  %v1272_v53 = vmul.f32 %v3390_v62, %v1070_v38  ;;  %2916 = vmatprep.subr.mxu0 %v2297_v26 }
 0x108   : > { %v1158_v3 = vmul.f32 %v3344_v41, %v1068_v16  ;;  %v3746_v47 = vmul.f32 %v3399_v0, %v1125_v22  ;;  %v3755_v16 = vadd.f32 %v1238_v42, %v1218_v34  ;;  %v5349_v37 = vrot.slane %v3572_v8, 7  ;;  %v2296_v34 = vld [vmem:[%s5225_s11 + $0x28] sm:$0xff]  ;;  %2917 = vmatpush3.msra.mxu0 %v2297_v26 }
 0x109   : > { %v995_v22 = vadd.f32 %v3322_v30, %v994_v7  ;;  %v3763_v18 = vadd.f32 %v1309_v11, %v1289_v15  ;;  %v3767_v40 = vmul.f32 %v3421_v14, %v3620_v17  ;;  %v3771_v42 = vmul.f32 %v3362_v51, %v3522_v12  ;;  %2918 = vmatprep.subr.mxu0 %v2296_v34 }
 0x10a   : > { %v1180_v46 = vadd.f32 %v3380_v56, %v1158_v3  ;;  %v1059_v38 = vsel %vm1043_vm1, %v5349_v37, %v1027_v59  ;;  %v3779_v7 = vmul.f32 %v3354_v49, %v3711_v9  ;;  %v3783_v11 = vmul.f32 %v3358_v50, %v3711_v9  ;;  %2919 = vmatpush3.msra.mxu0 %v2296_v34 }
 0x10b   : > { %5350 = vst [vmem:[#allocation33_spill] sm:$0xff] %v3767_v40  ;;  %5351 = vst [vmem:[#allocation34_spill] sm:$0xff] %v3771_v42  ;;  %v5352_v12 = vrot.slane %v3572_v8, 1  ;;  %v3792_v13 = vmul.f32 %v3362_v51, %v3711_v9  ;;  %v3796_v37 = vmul.f32 %v3362_v51, %v3694_v2  ;;  %v5353_v3 = vrot.slane %v3711_v9, 7 }
 0x10c   : > { %v1216_v17 = vadd.f32 %v3577_v54, %v1180_v46  ;;  %v3806_v8 = vsel %vm758_vm4, 0.0, %v1059_v38  ;;  %v2295_v54 = vld [vmem:[%s5225_s11 + $0x20] sm:$0xff]  ;;  %v3818_v40 = vmul.f32 %v3358_v50, %v3685_v33  ;;  %v1152_v26 = vsel %vm761_vm5, 0.0, %v1128_v27 }
 0x10d   : > { %v1124_v15 = vsel %vm1108_vm2, %v5352_v12, %v1092_v44  ;;  %v3802_v42 = vsel %vm1043_vm1, %v1027_v59, %v5353_v3  ;;  %v3814_v12 = vmul.f32 %v3354_v49, %v3685_v33  ;;  %v1021_v59 = vsel %vm3597_vm6, 0.0, %v995_v22  ;;  %v2294_v22 = vld [vmem:[%s5225_s11 + $0x18] sm:$0xff]  ;;  %2920 = vmatprep.subr.mxu0 %v2295_v54 }
 0x10e   : > { %v1252_v46 = vadd.f32 %v3580_v52, %v1216_v17  ;;  %v5354_v38 = vrot.slane %v3711_v9, 1  ;;  %v1136_v3 = vsel %vm761_vm5, 0.0, %v1124_v15  ;;  %v1041_v17 = vrot.slane %v1021_v59, 7  ;;  %2921 = vmatpush3.msra.mxu0 %v2295_v54 }
 0x10f   : > { %v1162_v6 = vmul.f32 %v3344_v41, %v3806_v8  ;;  %v1163_v27 = vmul.f32 %v3344_v41, %v3802_v42  ;;  %v1106_v25 = vrot.slane %v1021_v59, 1  ;;  %v5355_v15 = vrot.slane %v3694_v2, 7  ;;  %2922 = vmatprep.subr.mxu0 %v2294_v22 }
 0x110   : > { %v3828_v52 = vsel %vm1108_vm2, %v1092_v44, %v5354_v38  ;;  %v1339_v44 = vadd.f32 %v1323_v10, %v3674_v55  ;;  %v1288_v38 = vadd.f32 %v1272_v53, %v1252_v46  ;;  %v5356_v35 = vrot.slane %v3547_v43, 7  ;;  %v2293_v55 = vld [vmem:[%s5225_s11 + $0x10] sm:$0xff]  ;;  %2923 = vmatpush3.msra.mxu0 %v2294_v22 }
 0x111   : > { %v1044_v34 = vsel %vm1043_vm1, %v1041_v17, %v5355_v15  ;;  %v1358_v36 = vmul.f32 %v3399_v0, %v3626_v5  ;;  %v1239_v10 = vmul.f32 %v3388_v61, %v1136_v3  ;;  %v5357_v46 = vrot.slane %v3694_v2, 1  ;;  %v934_v2 = vpop.f32.mrf.mxu0  ;;  %2924 = vmatprep.subr.mxu0 %v2293_v55 }
 0x112   : > { %v1045_v57 = vsel %vm1043_vm1, %v5356_v35, %v1041_v17  ;;  %v5358_v35 = vrot.slane %v3547_v43, 1  ;;  %v1274_v54 = vmul.f32 %v3390_v62, %v3806_v8  ;;  %v2292_v43 = vld [vmem:[%s5225_s11 + $0x8] sm:$0xff]  ;;  %v1430_v22 = vmul.f32 %v3362_v51, %v1021_v59  ;;  %2925 = vmatpush3.msra.mxu0 %v2293_v55 }
 0x113   : > { %v1086_v53 = vsel %vm758_vm4, 0.0, %v1045_v57  ;;  %v1109_v15 = vsel %vm1108_vm2, %v1106_v25, %v5357_v46  ;;  %v1374_v39 = vadd.f32 %v1358_v36, %v3660_v45  ;;  %v1345_v46 = vmul.f32 %v3399_v0, %v1136_v3  ;;  %v2291_v3 = vld [vmem:[%s5225_s11] sm:$0xff]  ;;  %2926 = vmatprep.subr.mxu0 %v2292_v43 }
 0x114   : > { %v1110_v17 = vsel %vm1108_vm2, %v5358_v35, %v1106_v25  ;;  %v1394_v57 = vmul.f32 %v3421_v14, %v1086_v53  ;;  %v1445_v35 = vadd.f32 %v3734_v21, %v3682_v4  ;;  %v1184_v36 = vadd.f32 %v3380_v56, %v1162_v6  ;;  %2927 = vmatpush3.msra.mxu0 %v2292_v43 }
 0x115   : > { %v1150_v60 = vsel %vm761_vm5, 0.0, %v1110_v17  ;;  %v1324_v45 = vadd.f32 %v3738_v20, %v1288_v38  ;;  %v1395_v28 = vmul.f32 %v3421_v14, %v1044_v34  ;;  %v1255_v6 = vadd.f32 %v1239_v10, %v3742_v48  ;;  %2928 = vmatprep.subr.mxu0 %v2291_v3 }
 0x116   : > { %v1359_v25 = vmul.f32 %v3399_v0, %v1150_v60  ;;  %v1465_v31 = vmul.f32 %v3532_v32, %v1150_v60  ;;  %v1410_v53 = vadd.f32 %v1394_v57, %v1374_v39  ;;  %v3888_v60 = vadd.f32 %v3322_v30, %v934_v2  ;;  %2929 = vmatpush3.msra.mxu0 %v2291_v3 }
 0x117   : > { %v1275_v39 = vmul.f32 %v3390_v62, %v3802_v42  ;;  %v1466_v21 = vmul.f32 %v3532_v32, %v1109_v15  ;;  %v1290_v20 = vadd.f32 %v1274_v54, %v3755_v16  ;;  %v1361_v59 = vadd.f32 %v1345_v46, %v3763_v18 }
 0x118   : > { %v1375_v17 = vadd.f32 %v1359_v25, %v1339_v44  ;;  %v3885_v24 = vadd.f32 %v1465_v31, %v1445_v35  ;;  %v1446_v4 = vadd.f32 %v1430_v22, %v1410_v53  ;;  %v3897_v31 = vadd.f32 %v2857_v23, %v3322_v30 }
 0x119   : > { %v1381_v38 = vmul.f32 %v3421_v14, %v3802_v42  ;;  %v1029_v34 = vrot.slane %v3888_v60, 7  ;;  %v1094_v55 = vrot.slane %v3888_v60, 1  ;;  %v1467_v10 = vmul.f32 %v3532_v32, %v1152_v26 }
 0x11a   : > { %5359 = vst [vmem:[#allocation35_spill] sm:$0xff] %v3885_v24  ;;  %v1411_v44 = vadd.f32 %v1395_v28, %v1375_v17  ;;  %v3901_v48 = vadd.f32 %v1466_v21, %v1446_v4  ;;  %v1360_v16 = vadd.f32 %v3746_v47, %v1324_v45  ;;  %v1380_v28 = vmul.f32 %v3421_v14, %v3806_v8  ;;  %v2860_v4 = vpop.f32.mrf.mxu0 }
 0x11b   : > { %v1185_v18 = vadd.f32 %v3380_v56, %v1163_v27  ;;  %v1220_v42 = vadd.f32 %v3814_v12, %v1184_v36  ;;  %v1240_v15 = vmul.f32 %v3388_v61, %v3828_v52  ;;  %v5361_v54 = vrot.slane %v3711_v9, 7  ;;  %v3926_v12 = vld [vmem:[%s5220_s6] ss:$0 sm:$0xff] }
 0x11c   : > { %5360 = vst [vmem:[#allocation36_spill] sm:$0xff] %v3901_v48  ;;  %v1447_v23 = vadd.f32 %v3796_v37, %v1411_v44  ;;  %v1346_v47 = vmul.f32 %v3399_v0, %v3828_v52  ;;  %v1030_v8 = vrot.slane %v3897_v31, 7  ;;  %v2886_v37 = vpop.f32.mrf.mxu1  ;;  %v5363_v27 = vrot.slane %v3711_v9, 1 }
 0x11d   : > { %v1057_v57 = vsel %vm1043_vm1, %v5361_v54, %v1029_v34  ;;  %v1291_v43 = vadd.f32 %v1275_v39, %v1255_v6  ;;  %v1326_v46 = vadd.f32 %v3818_v40, %v1290_v20  ;;  %v1397_v25 = vadd.f32 %v1381_v38, %v1361_v59 }
 0x11e   : > { %v3920_v26 = vadd.f32 %v1467_v10, %v1447_v23  ;;  %v1122_v2 = vsel %vm1108_vm2, %v5363_v27, %v1094_v55  ;;  %v1074_v35 = vsel %vm758_vm4, 0.0, %v1057_v57  ;;  %v3937_v36 = vmul.f32 %v3532_v32, %v3644_v58  ;;  %v1561_v59 = vpop.f32.mrf.mxu1 }
 0x11f   : > { %v1396_v45 = vadd.f32 %v1380_v28, %v1360_v16  ;;  %v1416_v53 = vmul.f32 %v3362_v51, %v3685_v33  ;;  %v1138_v9 = vsel %vm761_vm5, 0.0, %v1122_v2  ;;  %v3945_v22 = vmul.f32 %v3532_v32, %v3626_v5 }
 0x120   : > { %5362 = vst [vmem:[#allocation37_spill] sm:$0xff] %v3920_v26  ;;  %5364 = vst [vmem:[#allocation38_spill] sm:$0xff] %v3937_v36  ;;  %v1221_v40 = vadd.f32 %v3779_v7, %v1185_v18  ;;  %v1095_v3 = vrot.slane %v3897_v31, 1  ;;  %v1567_v17 = vadd.f32 %v2886_v37, %v3926_v12  ;;  %v1256_v6 = vadd.f32 %v1240_v15, %v1220_v42  ;;  %v944_v15 = vpop.f32.mrf.mxu0 }
 0x121   : > { %5365 = vst [vmem:[#allocation39_spill] sm:$0xff] %v3945_v22  ;;  %v1452_v58 = vmul.f32 %v3532_v32, %v3828_v52  ;;  %v1056_v33 = vsel %vm1043_vm1, %v1029_v34, %v1030_v8  ;;  %v1164_v39 = vmul.f32 %v3344_v41, %v1074_v35  ;;  %v1327_v5 = vadd.f32 %v3783_v11, %v1291_v43 }
 0x122   : > { %v1362_v21 = vadd.f32 %v1346_v47, %v1326_v46  ;;  %v1433_v7 = vadd.f32 %v3792_v13, %v1397_v25  ;;  %v1241_v20 = vmul.f32 %v3388_v61, %v1138_v9  ;;  %v1432_v44 = vadd.f32 %v1416_v53, %v1396_v45  ;;  %v2863_v22 = vpop.f32.mrf.mxu0 }
 0x123   : > { %v1207_v52 = vmul.f32 %v3354_v49, %v3897_v31  ;;  %v1276_v38 = vmul.f32 %v3390_v62, %v1074_v35  ;;  %v1347_v10 = vmul.f32 %v3399_v0, %v1138_v9  ;;  %v1313_v34 = vmul.f32 %v3358_v50, %v3897_v31 }
 0x124   : > { %v3968_v11 = vsel %vm3401_vm3, 0.0, %v1567_v17  ;;  %v1121_v13 = vsel %vm1108_vm2, %v1094_v55, %v1095_v3  ;;  %v1165_v16 = vmul.f32 %v3344_v41, %v1056_v33  ;;  %v1186_v28 = vadd.f32 %v3380_v56, %v1164_v39 }
 0x125   : > { %v1206_v23 = vmul.f32 %v3354_v49, %v3888_v60  ;;  %v1382_v18 = vmul.f32 %v3421_v14, %v1074_v35  ;;  %v1562_v42 = vadd.f32 %v3926_v12, %v1561_v59  ;;  %v1419_v54 = vmul.f32 %v3362_v51, %v3897_v31 }
 0x126   : > { %v1257_v57 = vadd.f32 %v1241_v20, %v1221_v40  ;;  %v1277_v47 = vmul.f32 %v3390_v62, %v1056_v33  ;;  %v1312_v55 = vmul.f32 %v3358_v50, %v3888_v60  ;;  %v1292_v37 = vadd.f32 %v1276_v38, %v1256_v6 }
 0x127   : > { %v1363_v27 = vadd.f32 %v1347_v10, %v1327_v5  ;;  %v1383_v2 = vmul.f32 %v3421_v14, %v1056_v33  ;;  %v3986_v43 = vsel %vm3401_vm3, 0.0, %v1562_v42  ;;  %v3988_v46 = vadd.f32 %v1452_v58, %v1432_v44  ;;  %v2889_v5 = vpop.f32.mrf.mxu1 }
 0x128   : > { %5366 = vst [vmem:[#allocation40_spill] sm:$0xff] %v3986_v43  ;;  %v5253_v25 = vrot.slane %v3968_v11, 7  ;;  %v1242_v35 = vmul.f32 %v3388_v61, %v1121_v13  ;;  %v3993_v45 = vadd.f32 %v3322_v30, %v944_v15  ;;  %v1187_v53 = vadd.f32 %v3380_v56, %v1165_v16 }
 0x129   : > { %5367 = vst [vmem:[#allocation41_spill] sm:$0xff] %v3988_v46  ;;  %v1222_v40 = vadd.f32 %v1206_v23, %v1186_v28  ;;  %v1398_v17 = vadd.f32 %v1382_v18, %v1362_v21  ;;  %v1418_v6 = vmul.f32 %v3362_v51, %v3888_v60  ;;  %v3999_v1 = vmul.f32 0.044715, %v3901_v48 }
 0x12a   : > { %v5252_v58 = vrot.slane %v3968_v11, 1  ;;  %v1348_v33 = vmul.f32 %v3399_v0, %v1121_v13  ;;  %v5250_v39 = vrot.slane %v3986_v43, 7  ;;  %v1293_v20 = vadd.f32 %v1277_v47, %v1257_v57  ;;  %v1571_v57 = vpop.f32.mrf.mxu1 }
 0x12b   : > { %5368 = vst [vmem:[#allocation42_spill] sm:$0xff] %v3999_v1  ;;  %v1328_v59 = vadd.f32 %v1312_v55, %v1292_v37  ;;  %v1399_v44 = vadd.f32 %v1383_v2, %v1363_v27  ;;  %v4005_v38 = vadd.f32 %v2860_v4, %v3322_v30  ;;  %v1848_v21 = vmul.f32 %v3439_v19, %v3968_v11 }
 0x12c   : > { %v1453_v60 = vmul.f32 %v3532_v32, %v1138_v9  ;;  %v1031_v10 = vrot.slane %v3993_v45, 7  ;;  %v1096_v16 = vrot.slane %v3993_v45, 1  ;;  %v1223_v28 = vadd.f32 %v1207_v52, %v1187_v53 }
 0x12d   : > { %v1258_v23 = vadd.f32 %v1242_v35, %v1222_v40  ;;  %v1434_v18 = vadd.f32 %v1418_v6, %v1398_v17  ;;  %v1454_v42 = vmul.f32 %v3532_v32, %v1121_v13  ;;  %v1718_v4 = vsel %vm1043_vm1, %v5250_v39, %v5253_v25  ;;  %v4057_v40 = vld [vmem:[%s5224_s10] ss:$0 sm:$0xff] }
 0x12e   : > { %v5249_v15 = vrot.slane %v3986_v43, 1  ;;  %v1055_v9 = vsel %vm1043_vm1, %v1030_v8, %v1031_v10  ;;  %v1120_v52 = vsel %vm1108_vm2, %v1095_v3, %v1096_v16  ;;  %v1329_v47 = vadd.f32 %v1313_v34, %v1293_v20  ;;  %v5371_v3 = vld [vmem:[#allocation5_spill] sm:$0xff] }
 0x12f   : > { %v1364_v13 = vadd.f32 %v1348_v33, %v1328_v59  ;;  %v4026_v55 = vadd.f32 %v1419_v54, %v1399_v44  ;;  %v5251_v37 = vrot.slane %v4005_v38, 7  ;;  %v4029_v27 = vadd.f32 %v1453_v60, %v1433_v7 }
 0x130   : > { %v4032_v2 = vadd.f32 %v2889_v5, %v3926_v12  ;;  %v1076_v31 = vsel %vm758_vm4, 0.0, %v1055_v9  ;;  %v1140_v8 = vsel %vm761_vm5, 0.0, %v1120_v52  ;;  %v4038_v35 = vadd.f32 %v1454_v42, %v1434_v18  ;;  %v4076_v9 = vpop.f32.mrf.mxu1 }
 0x131   : > { %5369 = vst [vmem:[#allocation43_spill] sm:$0xff] %v4029_v27  ;;  %v1806_v34 = vmul.f32 %v5371_v3, %v1718_v4  ;;  %v4043_v54 = vmul.f32 %v3439_v19, %v3986_v43  ;;  %v4046_v7 = vadd.f32 %v3926_v12, %v1571_v57  ;;  %v1778_v53 = vsel %vm1108_vm2, %v5249_v15, %v5252_v58  ;;  %v5373_v57 = vld [vmem:[#allocation6_spill] sm:$0xff]  ;;  %v5375_v27 = vld [vmem:[#allocation7_spill] sm:$0xff] }
 0x132   : > { %5370 = vst [vmem:[#allocation44_spill] sm:$0xff] %v4038_v35  ;;  %v5261_v17 = vrot.slane %v4005_v38, 1  ;;  %v1209_v6 = vmul.f32 %v3354_v49, %v4005_v38  ;;  %v1315_v33 = vmul.f32 %v3358_v50, %v4005_v38  ;;  %v1421_v5 = vmul.f32 %v3362_v51, %v4005_v38  ;;  %v1581_v36 = vpop.f32.mrf.mxu1 }
 0x133   : > { %5372 = vst [vmem:[#allocation45_spill] sm:$0xff] %v4043_v54  ;;  %v1054_v20 = vsel %vm1043_vm1, %v1031_v10, %v5251_v37  ;;  %v1166_v59 = vmul.f32 %v3344_v41, %v1076_v31  ;;  %v1243_v44 = vmul.f32 %v3388_v61, %v1140_v8  ;;  %v1278_v42 = vmul.f32 %v3390_v62, %v1076_v31 }
 0x134   : > { %v1349_v4 = vmul.f32 %v3399_v0, %v1140_v8  ;;  %v1828_v52 = vadd.f32 %v4057_v40, %v1806_v34  ;;  %v4080_v15 = vmul.f32 %v5373_v57, %v1778_v53  ;;  %v4084_v10 = vmul.f32 %v3439_v19, %v4032_v2 }
 0x135   : > { %v1384_v39 = vmul.f32 %v3421_v14, %v1076_v31  ;;  %v1167_v37 = vmul.f32 %v3344_v41, %v1054_v20  ;;  %v1208_v18 = vmul.f32 %v3354_v49, %v3993_v45  ;;  %v1314_v58 = vmul.f32 %v3358_v50, %v3993_v45 }
 0x136   : > { %5374 = vst [vmem:[#allocation46_spill] sm:$0xff] %v4080_v15  ;;  %v1682_v60 = vrot.slane %v4046_v7, 7  ;;  %v1119_v34 = vsel %vm1108_vm2, %v1096_v16, %v5261_v17  ;;  %v1188_v53 = vadd.f32 %v3380_v56, %v1166_v59  ;;  %v1259_v25 = vadd.f32 %v1243_v44, %v1223_v28 }
 0x137   : > { %v1279_v31 = vmul.f32 %v3390_v62, %v1054_v20  ;;  %v1294_v26 = vadd.f32 %v1278_v42, %v1258_v23  ;;  %v1365_v1 = vadd.f32 %v1349_v4, %v1329_v47  ;;  %v1385_v48 = vmul.f32 %v3421_v14, %v1054_v20 }
 0x138   : > { %v1742_v24 = vrot.slane %v4046_v7, 1  ;;  %v4101_v35 = vadd.f32 %v1848_v21, %v1828_v52  ;;  %v4105_v46 = vmul.f32 %v5375_v27, %v4032_v2  ;;  %v1400_v16 = vadd.f32 %v1384_v39, %v1364_v13 }
 0x139   : > { %v1420_v28 = vmul.f32 %v3362_v51, %v3993_v45  ;;  %v1189_v59 = vadd.f32 %v3380_v56, %v1167_v37  ;;  %v1244_v23 = vmul.f32 %v3388_v61, %v1119_v34  ;;  %v1350_v47 = vmul.f32 %v3399_v0, %v1119_v34 }
 0x13a   : > { %v1455_v20 = vmul.f32 %v3532_v32, %v1140_v8  ;;  %v1224_v44 = vadd.f32 %v1208_v18, %v1188_v53  ;;  %v1295_v42 = vadd.f32 %v1279_v31, %v1259_v25  ;;  %v5376_v21 = vrot.slane %v3968_v11, 7  ;;  %v954_v18 = vpop.f32.mrf.mxu0  ;;  %v4130_v53 = vpop.f32.mrf.mxu1 }
 0x13b   : > { %v4118_v39 = vadd.f32 %v2863_v22, %v3322_v30  ;;  %v1330_v13 = vadd.f32 %v1314_v58, %v1294_v26  ;;  %v1401_v45 = vadd.f32 %v1385_v48, %v1365_v1  ;;  %v5377_v37 = vrot.slane %v4032_v2, 7  ;;  %5379 = vst [vmem:[#allocation7_spill] sm:$0xff] %v4130_v53  ;;  %v5394_v53 = vld [vmem:[#allocation8_spill] sm:$0xff] }
 0x13c   : > { %v1717_v4 = vsel %vm1043_vm1, %v5376_v21, %v1682_v60  ;;  %v5378_v8 = vrot.slane %v3968_v11, 1  ;;  %v1436_v31 = vadd.f32 %v1420_v28, %v1400_v16  ;;  %v1456_v22 = vmul.f32 %v3532_v32, %v1119_v34  ;;  %v5382_v28 = vld [vmem:[#allocation3_spill] sm:$0xff] }
 0x13d   : > { %v4124_v52 = vsel %vm1043_vm1, %v1682_v60, %v5377_v37  ;;  %v1034_v26 = vrot.slane %v4118_v39, 7  ;;  %v1099_v48 = vrot.slane %v4118_v39, 1  ;;  %v1225_v1 = vadd.f32 %v1209_v6, %v1189_v59 }
 0x13e   : > { %v1777_v25 = vsel %vm1108_vm2, %v5378_v8, %v1742_v24  ;;  %v4136_v58 = vadd.f32 %v1455_v20, %v4026_v55  ;;  %v1722_v11 = vsel %vm758_vm4, 0.0, %v1717_v4  ;;  %v5381_v60 = vrot.slane %v4032_v2, 1  ;;  %v4163_v8 = vpop.f32.mrf.mxu1 }
 0x13f   : > { %v1781_v34 = vsel %vm761_vm5, 0.0, %v1777_v25  ;;  %v1808_v16 = vmul.f32 %v5371_v3, %v4124_v52  ;;  %v5383_v6 = vrot.slane %v5382_v28, 7  ;;  %v4155_v59 = vadd.f32 %v3322_v30, %v954_v18 }
 0x140   : > { %5380 = vst [vmem:[#allocation47_spill] sm:$0xff] %v4136_v58  ;;  %v4144_v21 = vsel %vm1108_vm2, %v1742_v24, %v5381_v60  ;;  %v1260_v20 = vadd.f32 %v1244_v23, %v1224_v44  ;;  %v4157_v4 = vadd.f32 %v1315_v33, %v1295_v42  ;;  %v4159_v37 = vadd.f32 %v1350_v47, %v1330_v13  ;;  %v5391_v58 = vld [vmem:[#allocation17_spill] sm:$0xff] }
 0x141   : > { %v1051_v55 = vsel %vm1043_vm1, %v1034_v26, %v5383_v6  ;;  %v4165_v25 = vadd.f32 %v1421_v5, %v1401_v45  ;;  %v4167_v60 = vadd.f32 %v1456_v22, %v1436_v31  ;;  %v5386_v17 = vrot.slane %v5382_v28, 1  ;;  %v5388_v28 = vld [vmem:[#allocation14_spill] sm:$0xff] }
 0x142   : > { %v1080_v24 = vsel %vm758_vm4, 0.0, %v1051_v55  ;;  %v1807_v33 = vmul.f32 %v5371_v3, %v1722_v11  ;;  %v4177_v47 = vmul.f32 %v3439_v19, %v4046_v7  ;;  %v1884_v44 = vmul.f32 %v5373_v57, %v1781_v34 }
 0x143   : > { %5384 = vst [vmem:[#allocation3_spill] sm:$0xff] %v4165_v25  ;;  %5385 = vst [vmem:[#allocation48_spill] sm:$0xff] %v4167_v60  ;;  %v1116_v30 = vsel %vm1108_vm2, %v1099_v48, %v5386_v17  ;;  %v1170_v23 = vmul.f32 %v3344_v41, %v1080_v24  ;;  %v4182_v5 = vmul.f32 %v5373_v57, %v4144_v21  ;;  %v1033_v17 = vrot.slane %v4155_v59, 7 }
 0x144   : > { %v4185_v42 = vadd.f32 %v4057_v40, %v1808_v16  ;;  %v1098_v45 = vrot.slane %v4155_v59, 1  ;;  %v4192_v18 = vsel %vm761_vm5, 0.0, %v1116_v30  ;;  %v1211_v31 = vmul.f32 %v3354_v49, %v4118_v39  ;;  %v4201_v16 = vpop.f32.mrf.mxu1 }
 0x145   : > { %v1192_v13 = vadd.f32 %v3380_v56, %v1170_v23  ;;  %v1210_v22 = vmul.f32 %v3354_v49, %v4155_v59  ;;  %v4199_v34 = vadd.f32 %v3926_v12, %v1581_v36  ;;  %5387 = vst [vmem:[#allocation49_spill] sm:$0xff] %v4201_v16  ;;  %v1052_v55 = vsel %vm1043_vm1, %v1033_v17, %v1034_v26 }
 0x146   : > { %v5389_v23 = vrot.slane %v4005_v38, 7  ;;  %v4212_v60 = vsel %vm1108_vm2, %v1098_v45, %v1099_v48  ;;  %v5390_v36 = vrot.slane %v4005_v38, 1  ;;  %v1316_v26 = vmul.f32 %v3358_v50, %v4155_v59  ;;  %v4236_v54 = vpop.f32.mrf.mxu1 }
 0x147   : > { %v1228_v6 = vadd.f32 %v5388_v28, %v1192_v13  ;;  %v1169_v28 = vmul.f32 %v3344_v41, %v1052_v55  ;;  %5392 = vst [vmem:[#allocation14_spill] sm:$0xff] %v4236_v54  ;;  %v1317_v16 = vmul.f32 %v3358_v50, %v4118_v39  ;;  %v4247_v63 = vmul.f32 %v5394_v53, %v1722_v11  ;;  %v5395_v54 = vld [vmem:[#allocation24_spill] sm:$0xff] }
 0x148   : > { %v1053_v30 = vsel %vm1043_vm1, %v5389_v23, %v1033_v17  ;;  %v1118_v13 = vsel %vm1108_vm2, %v5390_v36, %v1098_v45  ;;  %v1281_v36 = vmul.f32 %v3390_v62, %v1052_v55  ;;  %v1282_v50 = vmul.f32 %v3390_v62, %v1080_v24 }
 0x149   : > { %v1078_v49 = vsel %vm758_vm4, 0.0, %v1053_v30  ;;  %v1264_v15 = vadd.f32 %v5391_v58, %v1228_v6  ;;  %v4226_v17 = vsel %vm761_vm5, 0.0, %v1118_v13  ;;  %v1191_v38 = vadd.f32 %v3380_v56, %v1169_v28  ;;  %v5393_v58 = vld [vmem:[#allocation23_spill] sm:$0xff] }
 0x14a   : > { %v1168_v48 = vmul.f32 %v3344_v41, %v1078_v49  ;;  %v1280_v23 = vmul.f32 %v3390_v62, %v1078_v49  ;;  %v1245_v45 = vmul.f32 %v3388_v61, %v4226_v17  ;;  %v1246_v30 = vmul.f32 %v3388_v61, %v4212_v60 }
 0x14b   : > { %v1300_v6 = vadd.f32 %v5393_v58, %v1264_v15  ;;  %v1352_v41 = vmul.f32 %v3399_v0, %v4212_v60  ;;  %v1247_v28 = vmul.f32 %v3388_v61, %v4192_v18  ;;  %v1227_v57 = vadd.f32 %v1211_v31, %v1191_v38  ;;  %v4254_v61 = vpop.f32.mrf.mxu1  ;;  %v5397_v38 = vld [vmem:[#allocation18_spill] sm:$0xff] }
 0x14c   : > { %v1190_v13 = vadd.f32 %v3380_v56, %v1168_v48  ;;  %v1296_v43 = vadd.f32 %v1280_v23, %v1260_v20  ;;  %v1261_v25 = vadd.f32 %v1245_v45, %v1225_v1  ;;  %v1829_v20 = vadd.f32 %v4057_v40, %v1807_v33 }
 0x14d   : > { %v4250_v3 = vadd.f32 %v5395_v54, %v1300_v6  ;;  %v1900_v48 = vadd.f32 %v1884_v44, %v4101_v35  ;;  %v1263_v23 = vadd.f32 %v1247_v28, %v1227_v57  ;;  %v1388_v1 = vmul.f32 %v3421_v14, %v1080_v24  ;;  %v5398_v44 = vld [vmem:[#allocation10_spill] sm:$0xff]  ;;  %v5402_v28 = vld [vmem:[#allocation21_spill] sm:$0xff] }
 0x14e   : > { %v1226_v15 = vadd.f32 %v1210_v22, %v1190_v13  ;;  %v1332_v56 = vadd.f32 %v1316_v26, %v1296_v43  ;;  %v1297_v58 = vadd.f32 %v1281_v36, %v1261_v25  ;;  %v1353_v54 = vmul.f32 %v3399_v0, %v4192_v18  ;;  %v5401_v13 = vld [vmem:[#allocation16_spill] sm:$0xff] }
 0x14f   : > { %5396 = vst [vmem:[#allocation17_spill] sm:$0xff] %v4250_v3  ;;  %v1299_v22 = vadd.f32 %v5397_v38, %v1263_v23  ;;  %v1684_v33 = vrot.slane %v4199_v34, 7  ;;  %v1920_v35 = vmul.f32 %v5394_v53, %v4124_v52  ;;  %v1351_v25 = vmul.f32 %v3399_v0, %v4226_v17  ;;  %v5400_v0 = vld [vmem:[#allocation15_spill] sm:$0xff] }
 0x150   : > { %v1262_v31 = vadd.f32 %v1246_v30, %v1226_v15  ;;  %v1368_v11 = vadd.f32 %v1352_v41, %v1332_v56  ;;  %v1333_v43 = vadd.f32 %v1317_v16, %v1297_v58  ;;  %v4268_v24 = vmul.f32 %v5375_v27, %v4046_v7  ;;  %v4274_v30 = vpop.f32.mrf.mxu1 }
 0x151   : > { %v4271_v26 = vadd.f32 %v5398_v44, %v1299_v22  ;;  %v1386_v16 = vmul.f32 %v3421_v14, %v1078_v49  ;;  %v1865_v36 = vadd.f32 %v4177_v47, %v1829_v20  ;;  %v4279_v52 = vadd.f32 %v4076_v9, %v3926_v12  ;;  %v5405_v20 = vld [vmem:[#allocation20_spill] sm:$0xff] }
 0x152   : > { %v1298_v57 = vadd.f32 %v1282_v50, %v1262_v31  ;;  %v1404_v62 = vadd.f32 %v1388_v1, %v1368_v11  ;;  %v1369_v45 = vadd.f32 %v1353_v54, %v1333_v43  ;;  %v1936_v7 = vadd.f32 %v1920_v35, %v1900_v48  ;;  %v5406_v50 = vld [vmem:[#allocation22_spill] sm:$0xff]  ;;  %v5408_v31 = vld [vmem:[#allocation9_spill] sm:$0xff]  ;;  %v4308_v38 = vpop.f32.mrf.mxu1  ;;  %v5409_v22 = vld [vmem:[#allocation28_spill] sm:$0xff] }
 0x153   : > { %5399 = vst [vmem:[#allocation23_spill] sm:$0xff] %v4271_v26  ;;  %v5404_v56 = vrot.slane %v4032_v2, 7  ;;  %v5271_v23 = vrot.slane %v4199_v34, 1  ;;  %v1367_v47 = vadd.f32 %v1351_v25, %v4157_v4  ;;  %v1387_v58 = vmul.f32 %v3421_v14, %v1052_v55  ;;  %v5413_v25 = vld [vmem:[#allocation5_spill] sm:$0xff] }
 0x154   : > { %v1334_v6 = vadd.f32 %v5400_v0, %v1298_v57  ;;  %v1440_v41 = vadd.f32 %v5401_v13, %v1404_v62  ;;  %v4284_v15 = vadd.f32 %v5402_v28, %v1369_v45  ;;  %v4299_v48 = vadd.f32 %v4084_v10, %v4185_v42  ;;  %v4345_v44 = vpop.f32.mrf.mxu1 }
 0x155   : > { %v1715_v49 = vsel %vm1043_vm1, %v5404_v56, %v1684_v33  ;;  %v4303_v11 = vmul.f32 %v5408_v31, %v4144_v21  ;;  %v1402_v54 = vadd.f32 %v1386_v16, %v4159_v37  ;;  %v1422_v4 = vmul.f32 %v3362_v51, %v4155_v59 }
 0x156   : > { %5403 = vst [vmem:[#allocation8_spill] sm:$0xff] %v4284_v15  ;;  %v1370_v9 = vadd.f32 %v5405_v20, %v1334_v6  ;;  %v4295_v1 = vadd.f32 %v5406_v50, %v1440_v41  ;;  %v1423_v14 = vmul.f32 %v3362_v51, %v4118_v39  ;;  %v1685_v55 = vrot.slane %v4279_v52, 7  ;;  %v5418_v6 = vld [vmem:[#allocation11_spill] sm:$0xff] }
 0x157   : > { %v4318_v10 = vsel %vm758_vm4, 0.0, %v1715_v49  ;;  %v1901_v21 = vadd.f32 %v4182_v5, %v1865_v36  ;;  %v1972_v37 = vadd.f32 %v4105_v46, %v1936_v7  ;;  %v1457_v59 = vmul.f32 %v3532_v32, %v4226_v17  ;;  %v5416_v36 = vld [vmem:[#allocation7_spill] sm:$0xff]  ;;  %v5422_v49 = vld [vmem:[#allocation14_spill] sm:$0xff] }
 0x158   : > { %5407 = vst [vmem:[#allocation24_spill] sm:$0xff] %v4295_v1  ;;  %v4314_v43 = vadd.f32 %v5409_v22, %v1370_v9  ;;  %v5411_v51 = vrot.slane %v4032_v2, 1  ;;  %v5272_v42 = vrot.slane %v4279_v52, 1  ;;  %v4333_v35 = vmul.f32 %v3439_v19, %v4279_v52  ;;  %v5419_v41 = vld [vmem:[#allocation3_spill] sm:$0xff] }
 0x159   : > { %v1403_v57 = vadd.f32 %v1387_v58, %v1367_v47  ;;  %v4337_v46 = vadd.f32 %v3926_v12, %v4163_v8  ;;  %v1438_v5 = vadd.f32 %v1422_v4, %v1402_v54  ;;  %v1458_v17 = vmul.f32 %v3532_v32, %v4212_v60  ;;  %v4384_v54 = vpop.f32.mrf.mxu1 }
 0x15a   : > { %5410 = vst [vmem:[#allocation18_spill] sm:$0xff] %v4314_v43  ;;  %v1775_v39 = vsel %vm1108_vm2, %v5411_v51, %v5271_v23  ;;  %5412 = vst [vmem:[#allocation10_spill] sm:$0xff] %v4333_v35  ;;  %v1714_v2 = vsel %vm1043_vm1, %v1684_v33, %v1685_v55  ;;  %v1809_v62 = vmul.f32 %v5413_v25, %v4318_v10 }
 0x15b   : > { %v4349_v45 = vmul.f32 %v3532_v32, %v4192_v18  ;;  %v1783_v8 = vsel %vm761_vm5, 0.0, %v1775_v39  ;;  %v4355_v0 = vadd.f32 %v5416_v36, %v3926_v12  ;;  %v1686_v60 = vrot.slane %v4337_v46, 7 }
 0x15c   : > { %v4360_v33 = vmul.f32 %v5375_v27, %v4279_v52  ;;  %v4364_v13 = vmul.f32 %v5418_v6, %v4279_v52  ;;  %v4367_v32 = vadd.f32 %v1457_v59, %v5419_v41  ;;  %v1921_v18 = vmul.f32 %v5394_v53, %v4318_v10 }
 0x15d   : > { %5414 = vst [vmem:[#allocation15_spill] sm:$0xff] %v4349_v45  ;;  %v4371_v7 = vadd.f32 %v1423_v14, %v1403_v57  ;;  %v1810_v28 = vmul.f32 %v5413_v25, %v1714_v2  ;;  %v1713_v56 = vsel %vm1043_vm1, %v1685_v55, %v1686_v60  ;;  %v4378_v47 = vadd.f32 %v3926_v12, %v5422_v49  ;;  %v5424_v14 = vld [vmem:[#allocation6_spill] sm:$0xff]  ;;  %v5425_v57 = vld [vmem:[#allocation49_spill] sm:$0xff] }
 0x15e   : > { %5417 = vst [vmem:[#allocation16_spill] sm:$0xff] %v4360_v33  ;;  %5420 = vst [vmem:[#allocation21_spill] sm:$0xff] %v4367_v32  ;;  %v4380_v20 = vadd.f32 %v1458_v17, %v1438_v5  ;;  %v1831_v9 = vadd.f32 %v4057_v40, %v1809_v62  ;;  %v1937_v58 = vadd.f32 %v1921_v18, %v1901_v21  ;;  %v1687_v55 = vrot.slane %v4355_v0, 7  ;;  %v5430_v18 = vld [vmem:[#allocation12_spill] sm:$0xff] }
 0x15f   : > { %5421 = vst [vmem:[#allocation20_spill] sm:$0xff] %v4371_v7  ;;  %v1992_v50 = vmul.f32 %v5408_v31, %v1783_v8  ;;  %v1851_v4 = vmul.f32 %v3439_v19, %v4199_v34  ;;  %v4389_v22 = vmul.f32 %v5424_v14, %v1783_v8  ;;  %v5270_v59 = vrot.slane %v4337_v46, 1 }
 0x160   : > { %5423 = vst [vmem:[#allocation22_spill] sm:$0xff] %v4380_v20  ;;  %v1957_v51 = vmul.f32 %v5375_v27, %v4199_v34  ;;  %v4397_v21 = vsel %vm758_vm4, 0.0, %v1713_v56  ;;  %v4401_v5 = vadd.f32 %v5425_v57, %v3926_v12  ;;  %v4404_v17 = vadd.f32 %v4057_v40, %v1810_v28  ;;  %v1631_v28 = vpop.f32.mrf.mxu1 }
 0x161   : > { %v2008_v39 = vadd.f32 %v1992_v50, %v1972_v37  ;;  %v4407_v62 = vmul.f32 %v5394_v53, %v1714_v2  ;;  %v4411_v8 = vsel %vm1043_vm1, %v1686_v60, %v1687_v55  ;;  %v1688_v37 = vrot.slane %v4378_v47, 7 }
 0x162   : > { %5426 = vst [vmem:[#allocation9_spill] sm:$0xff] %v4401_v5  ;;  %5427 = vst [vmem:[#allocation28_spill] sm:$0xff] %v4404_v17  ;;  %v4414_v36 = vadd.f32 %v1851_v4, %v1831_v9  ;;  %v4416_v41 = vadd.f32 %v1957_v51, %v1937_v58  ;;  %v2028_v56 = vmul.f32 %v5430_v18, %v1714_v2  ;;  %v1689_v4 = vrot.slane %v4401_v5, 7  ;;  %v2910_v26 = vpop.f32.mrf.mxu1 }
 0x163   : > { %5428 = vst [vmem:[#allocation5_spill] sm:$0xff] %v4407_v62  ;;  %5429 = vst [vmem:[#allocation4_spill] sm:$0xff] %v4411_v8  ;;  %v4421_v49 = vmul.f32 %v5418_v6, %v4199_v34  ;;  %v4426_v57 = vmul.f32 %v3439_v19, %v4355_v0  ;;  %v1773_v60 = vsel %vm1108_vm2, %v5272_v42, %v5270_v59 }
 0x164   : > { %v1811_v2 = vmul.f32 %v5413_v25, %v4397_v21  ;;  %v4436_v9 = vadd.f32 %v2028_v56, %v2008_v39  ;;  %v1812_v58 = vmul.f32 %v5413_v25, %v4411_v8  ;;  %v1711_v51 = vsel %vm1043_vm1, %v1687_v55, %v1688_v37 }
 0x165   : > { %5431 = vst [vmem:[#allocation7_spill] sm:$0xff] %v4421_v49  ;;  %5432 = vst [vmem:[#allocation3_spill] sm:$0xff] %v4426_v57  ;;  %v4445_v50 = vmul.f32 %v5375_v27, %v4355_v0  ;;  %v4449_v59 = vmul.f32 %v5418_v6, %v4355_v0  ;;  %v1853_v39 = vmul.f32 %v3439_v19, %v4337_v46  ;;  %v4459_v23 = vsel %vm761_vm5, 0.0, %v1773_v60 }
 0x166   : > { %v4455_v56 = vmul.f32 %v5375_v27, %v4337_v46  ;;  %5436 = vst [vmem:[#allocation12_spill] sm:$0xff] %v4459_v23  ;;  %v4463_v55 = vmul.f32 %v5418_v6, %v4337_v46  ;;  %v4468_v3 = vsel %vm1043_vm1, %v1688_v37, %v1689_v4  ;;  %v1833_v43 = vadd.f32 %v4057_v40, %v1811_v2  ;;  %v4486_v37 = vld [vmem:[%s5223_s9 + $0x8] ss:$0 sm:$0xff] }
 0x167   : > { %5433 = vst [vmem:[#allocation14_spill] sm:$0xff] %v4445_v50  ;;  %5434 = vst [vmem:[#allocation6_spill] sm:$0xff] %v4449_v59  ;;  %v4473_v15 = vmul.f32 %v5394_v53, %v4397_v21  ;;  %v4477_v60 = vmul.f32 %v5394_v53, %v4411_v8  ;;  %v4481_v1 = vsel %vm758_vm4, 0.0, %v1711_v51  ;;  %v4489_v42 = vadd.f32 %v4057_v40, %v1812_v58 }
 0x168   : > { %5435 = vst [vmem:[#allocation49_spill] sm:$0xff] %v4455_v56  ;;  %5437 = vst [vmem:[#allocation50_spill] sm:$0xff] %v4463_v55  ;;  %v4493_v2 = vmul.f32 %v3439_v19, %v4401_v5  ;;  %v4497_v45 = vadd.f32 %v4254_v61, %v3926_v12  ;;  %v4501_v51 = vadd.f32 %v3926_v12, %v4274_v30 }
 0x169   : > { %5438 = vst [vmem:[#allocation51_spill] sm:$0xff] %v4468_v3  ;;  %5439 = vst [vmem:[#allocation52_spill] sm:$0xff] %v4473_v15  ;;  %v4505_v7 = vmul.f32 %v5424_v14, %v4459_v23  ;;  %v4509_v58 = vmul.f32 %v4486_v37, %v4459_v23  ;;  %v4513_v59 = vmul.f32 %v5375_v27, %v4401_v5 }
 0x16a   : > { %5440 = vst [vmem:[#allocation53_spill] sm:$0xff] %v4477_v60  ;;  %5441 = vst [vmem:[#allocation54_spill] sm:$0xff] %v4481_v1  ;;  %v1814_v61 = vmul.f32 %v5413_v25, %v4468_v3  ;;  %v1813_v20 = vmul.f32 %v5413_v25, %v4481_v1  ;;  %v1855_v50 = vmul.f32 %v3439_v19, %v4378_v47  ;;  %v1641_v60 = vpop.f32.mrf.mxu1 }
 0x16b   : > { %5442 = vst [vmem:[#allocation55_spill] sm:$0xff] %v4489_v42  ;;  %5443 = vst [vmem:[#allocation56_spill] sm:$0xff] %v4493_v2  ;;  %v4519_v2 = vmul.f32 %v5418_v6, %v4401_v5  ;;  %v4526_v32 = vadd.f32 %v1853_v39, %v1833_v43  ;;  %v4534_v8 = vmul.f32 %v5375_v27, %v4378_v47  ;;  %v1691_v5 = vrot.slane %v4497_v45, 7 }
 0x16c   : > { %5444 = vst [vmem:[#allocation57_spill] sm:$0xff] %v4497_v45  ;;  %5445 = vst [vmem:[#allocation58_spill] sm:$0xff] %v4501_v51  ;;  %v4538_v30 = vmul.f32 %v5418_v6, %v4378_v47  ;;  %v1690_v43 = vrot.slane %v4501_v51, 7  ;;  %v4548_v39 = vadd.f32 %v3926_v12, %v4345_v44  ;;  %v4569_v44 = vmul.f32 %v5418_v6, %v4497_v45 }
 0x16d   : > { %5446 = vst [vmem:[#allocation59_spill] sm:$0xff] %v4505_v7  ;;  %5447 = vst [vmem:[#allocation60_spill] sm:$0xff] %v4509_v58 }
 0x16e   : > { %5448 = vst [vmem:[#allocation61_spill] sm:$0xff] %v4513_v59  ;;  %5449 = vst [vmem:[#allocation62_spill] sm:$0xff] %v4519_v2  ;;  %v4530_v59 = vmul.f32 %v5394_v53, %v4468_v3  ;;  %v4542_v2 = vmul.f32 %v5394_v53, %v4481_v1  ;;  %v4565_v1 = vmul.f32 %v5375_v27, %v4497_v45  ;;  %v2913_v3 = vpop.f32.mrf.mxu1 }
 0x16f   : > { %5450 = vst [vmem:[#allocation63_spill] sm:$0xff] %v4526_v32  ;;  %5452 = vst [vmem:[#allocation65_spill] sm:$0xff] %v4534_v8  ;;  %v4560_v8 = vadd.f32 %v4308_v38, %v3926_v12  ;;  %v4576_v38 = vadd.f32 %v4384_v54, %v3926_v12 }
 0x170   : > { %5451 = vst [vmem:[#allocation64_spill] sm:$0xff] %v4530_v59  ;;  %5453 = vst [vmem:[#allocation66_spill] sm:$0xff] %v4538_v30  ;;  %v4551_v59 = vadd.f32 %v4057_v40, %v1814_v61  ;;  %v4556_v30 = vmul.f32 %v3439_v19, %v4497_v45  ;;  %v5283_v61 = vrot.slane %v4548_v39, 7 }
 0x171   : > { %5454 = vst [vmem:[#allocation67_spill] sm:$0xff] %v4542_v2  ;;  %v1835_v2 = vadd.f32 %v4057_v40, %v1813_v20  ;;  %5457 = vst [vmem:[#allocation70_spill] sm:$0xff] %v4565_v1  ;;  %v4579_v20 = vadd.f32 %v3926_v12, %v1631_v28  ;;  %v4583_v1 = vsel %vm1043_vm1, %v1690_v43, %v1691_v5  ;;  %v5287_v45 = vrot.slane %v4560_v8, 1 }
 0x172   : > { %5455 = vst [vmem:[#allocation68_spill] sm:$0xff] %v4551_v59  ;;  %5456 = vst [vmem:[#allocation69_spill] sm:$0xff] %v4556_v30  ;;  %v4591_v59 = vmul.f32 %v5375_v27, %v4501_v51  ;;  %v1707_v54 = vsel %vm1043_vm1, %v1691_v5, %v5283_v61  ;;  %v4599_v28 = vsel %vm1043_vm1, %v1689_v4, %v1690_v43  ;;  %v1651_v43 = vpop.f32.mrf.mxu1  ;;  %v5465_v61 = vrot.slane %v4548_v39, 1 }
 0x173   : > { %5458 = vst [vmem:[#allocation71_spill] sm:$0xff] %v4569_v44  ;;  %5459 = vst [vmem:[#allocation72_spill] sm:$0xff] %v4576_v38  ;;  %v4587_v44 = vmul.f32 %v3439_v19, %v4501_v51  ;;  %v4603_v30 = vmul.f32 %v5418_v6, %v4501_v51  ;;  %v4608_v56 = vsel %vm758_vm4, 0.0, %v1707_v54  ;;  %v4616_v4 = vadd.f32 %v2910_v26, %v3926_v12 }
 0x174   : > { %5460 = vst [vmem:[#allocation73_spill] sm:$0xff] %v4579_v20  ;;  %5461 = vst [vmem:[#allocation74_spill] sm:$0xff] %v4583_v1  ;;  %v1817_v5 = vmul.f32 %v5413_v25, %v4608_v56  ;;  %v1859_v26 = vmul.f32 %v3439_v19, %v4548_v39  ;;  %v1657_v51 = vadd.f32 %v2913_v3, %v3926_v12  ;;  %v1755_v23 = vrot.slane %v4576_v38, 1 }
 0x175   : > { %5462 = vst [vmem:[#allocation75_spill] sm:$0xff] %v4591_v59  ;;  %5463 = vst [vmem:[#allocation76_spill] sm:$0xff] %v4603_v30  ;;  %v4610_v59 = vadd.f32 %v1855_v50, %v1835_v2  ;;  %v4624_v30 = vsel %vm1108_vm2, %v5465_v61, %v5287_v45  ;;  %v1695_v50 = vrot.slane %v4576_v38, 7  ;;  %v1694_v2 = vrot.slane %v4579_v20, 7 }
 0x176   : > { %5466 = vst [vmem:[#allocation78_spill] sm:$0xff] %v4624_v30  ;;  %v1839_v7 = vadd.f32 %v4057_v40, %v1817_v5  ;;  %v5468_v45 = vrot.slane %v4560_v8, 7  ;;  %v1652_v5 = vadd.f32 %v3926_v12, %v1651_v43  ;;  %v1895_v35 = vmul.f32 %v5424_v14, %v4624_v30 }
 0x177   : > { %5464 = vst [vmem:[#allocation77_spill] sm:$0xff] %v4610_v59  ;;  %v1642_v59 = vadd.f32 %v3926_v12, %v1641_v60  ;;  %v4637_v61 = vsel %vm1043_vm1, %v1694_v2, %v1695_v50  ;;  %v1862_v17 = vmul.f32 %v3439_v19, %v4576_v38  ;;  %v5470_v33 = vrot.slane %v4579_v20, 1 }
 0x178   : > { %5467 = vst [vmem:[#allocation79_spill] sm:$0xff] %v4637_v61  ;;  %v1705_v54 = vsel %vm1043_vm1, %v5468_v45, %v1694_v2  ;;  %v1875_v32 = vadd.f32 %v1859_v26, %v1839_v7  ;;  %v1820_v60 = vmul.f32 %v5413_v25, %v4637_v61  ;;  %v1861_v57 = vmul.f32 %v3439_v19, %v4579_v20 }
 0x179   : > { %v4648_v3 = vsel %vm758_vm4, 0.0, %v1705_v54  ;;  %v4658_v45 = vsel %vm1108_vm2, %v5470_v33, %v1755_v23  ;;  %v1696_v54 = vrot.slane %v1642_v59, 7  ;;  %v1756_v26 = vrot.slane %v1642_v59, 1 }
 0x17a   : > { %5469 = vst [vmem:[#allocation80_spill] sm:$0xff] %v4648_v3  ;;  %5471 = vst [vmem:[#allocation81_spill] sm:$0xff] %v4658_v45  ;;  %v1819_v12 = vmul.f32 %v5413_v25, %v4648_v3  ;;  %v1931_v7 = vmul.f32 %v5394_v53, %v4648_v3  ;;  %v1911_v43 = vadd.f32 %v1895_v35, %v1875_v32  ;;  %v1697_v42 = vrot.slane %v4616_v4, 7 }
 0x17b   : > { %v1842_v2 = vadd.f32 %v4057_v40, %v1820_v60  ;;  %v1967_v33 = vmul.f32 %v5375_v27, %v4579_v20  ;;  %v1757_v55 = vrot.slane %v4616_v4, 1  ;;  %v1703_v35 = vsel %vm1043_vm1, %v1695_v50, %v1696_v54 }
 0x17c   : > { %v1841_v30 = vadd.f32 %v4057_v40, %v1819_v12  ;;  %v1947_v15 = vadd.f32 %v1931_v7, %v1911_v43  ;;  %v1897_v32 = vmul.f32 %v5424_v14, %v4658_v45  ;;  %v1736_v12 = vsel %vm758_vm4, 0.0, %v1703_v35 }
 0x17d   : > { %v1763_v3 = vsel %vm1108_vm2, %v1755_v23, %v1756_v26  ;;  %v1878_v49 = vadd.f32 %v1862_v17, %v1842_v2  ;;  %v4682_v7 = vsel %vm1043_vm1, %v1696_v54, %v1697_v42  ;;  %v2003_v50 = vmul.f32 %v5408_v31, %v4658_v45 }
 0x17e   : > { %v1877_v60 = vadd.f32 %v1861_v57, %v1841_v30  ;;  %v1983_v20 = vadd.f32 %v1967_v33, %v1947_v15  ;;  %v4686_v43 = vsel %vm761_vm5, 0.0, %v1763_v3  ;;  %v1933_v35 = vmul.f32 %v5394_v53, %v1736_v12 }
 0x17f   : > { %5472 = vst [vmem:[#allocation82_spill] sm:$0xff] %v4686_v43  ;;  %v1898_v57 = vmul.f32 %v5424_v14, %v4686_v43  ;;  %v1969_v23 = vmul.f32 %v5375_v27, %v1642_v59  ;;  %v4696_v15 = vsel %vm1108_vm2, %v1756_v26, %v1757_v55  ;;  %v2039_v2 = vmul.f32 %v5430_v18, %v1736_v12 }
 0x180   : > { %v1913_v30 = vadd.f32 %v1897_v32, %v1877_v60  ;;  %5473 = vst [vmem:[#allocation83_spill] sm:$0xff] %v4696_v15  ;;  %v2019_v17 = vadd.f32 %v2003_v50, %v1983_v20  ;;  %v4701_v54 = vsel %vm3597_vm6, 0.0, %v1657_v51  ;;  %v1934_v45 = vmul.f32 %v5394_v53, %v4682_v7  ;;  %v5476_v50 = vld [vmem:[#allocation40_spill] sm:$0xff] }
 0x181   : > { %v1914_v33 = vadd.f32 %v1898_v57, %v1878_v49  ;;  %v1699_v60 = vrot.slane %v4701_v54, 7  ;;  %v2075_v62 = vmul.f32 %v5418_v6, %v1642_v59  ;;  %v4709_v26 = vmul.f32 %v5418_v6, %v4701_v54 }
 0x182   : > { %v1949_v32 = vadd.f32 %v1933_v35, %v1913_v30  ;;  %v2055_v58 = vadd.f32 %v2039_v2, %v2019_v17  ;;  %v1678_v20 = vsel %vm3597_vm6, 0.0, %v1652_v5  ;;  %v4716_v49 = vsel %vm758_vm4, 0.0, %v4599_v28 }
 0x183   : > { %5475 = vst [vmem:[#allocation25_spill] sm:$0xff] %v4709_v26  ;;  %v1950_v51 = vadd.f32 %v1934_v45, %v1914_v33  ;;  %v5477_v57 = vrot.slane %v5476_v50, 7  ;;  %v1698_v17 = vrot.slane %v1678_v20, 7  ;;  %v2005_v5 = vmul.f32 %v5408_v31, %v4696_v15 }
 0x184   : > { %v1985_v12 = vadd.f32 %v1969_v23, %v1949_v32  ;;  %v4722_v59 = vadd.f32 %v2075_v62, %v2055_v58  ;;  %v1816_v28 = vmul.f32 %v5413_v25, %v4583_v1  ;;  %v1970_v45 = vmul.f32 %v5375_v27, %v4616_v4 }
 0x185   : > { %v1719_v30 = vsel %vm1043_vm1, %v1699_v60, %v5477_v57  ;;  %v1758_v2 = vrot.slane %v1678_v20, 1  ;;  %v1815_v62 = vmul.f32 %v5413_v25, %v4716_v49  ;;  %v1759_v58 = vrot.slane %v4701_v54, 1 }
 0x186   : > { %5478 = vst [vmem:[#allocation40_spill] sm:$0xff] %v4722_v59  ;;  %v1720_v35 = vsel %vm758_vm4, 0.0, %v1719_v30  ;;  %v1701_v3 = vsel %vm1043_vm1, %v1697_v42, %v1698_v17  ;;  %v2021_v33 = vadd.f32 %v2005_v5, %v1985_v12  ;;  %v1986_v59 = vadd.f32 %v1970_v45, %v1950_v51 }
 0x187   : > { %v1805_v23 = vmul.f32 %v5413_v25, %v1720_v35  ;;  %v1738_v57 = vsel %vm758_vm4, 0.0, %v1701_v3  ;;  %v1761_v30 = vsel %vm1108_vm2, %v1757_v55, %v1758_v2  ;;  %v4745_v35 = vmul.f32 %v5394_v53, %v4583_v1 }
 0x188   : > { %v1700_v54 = vsel %vm1043_vm1, %v1698_v17, %v1699_v60  ;;  %v4751_v42 = vsel %vm761_vm5, 0.0, %v1761_v30  ;;  %v2041_v12 = vmul.f32 %v5430_v18, %v1738_v57  ;;  %v4756_v5 = vmul.f32 %v5394_v53, %v4716_v49 }
 0x189   : > { %v1827_v32 = vadd.f32 %v4057_v40, %v1805_v23  ;;  %5479 = vst [vmem:[#allocation84_spill] sm:$0xff] %v4745_v35  ;;  %5480 = vst [vmem:[#allocation85_spill] sm:$0xff] %v4751_v42  ;;  %v5481_v23 = vld [vmem:[#allocation45_spill] sm:$0xff]  ;;  %v1760_v51 = vsel %vm1108_vm2, %v1758_v2, %v1759_v58  ;;  %v2006_v45 = vmul.f32 %v5408_v31, %v4751_v42  ;;  %v5483_v17 = vrot.slane %v4560_v8, 7  ;;  %v5485_v2 = vld [vmem:[#allocation46_spill] sm:$0xff] }
 0x18a   : > { %v4764_v60 = vadd.f32 %v4057_v40, %v1816_v28  ;;  %v5484_v3 = vrot.slane %v4548_v39, 7  ;;  %v2057_v30 = vadd.f32 %v2041_v12, %v2021_v33  ;;  %v2042_v42 = vmul.f32 %v5430_v18, %v1700_v54 }
 0x18b   : > { %v1863_v55 = vadd.f32 %v5481_v23, %v1827_v32  ;;  %v2077_v32 = vmul.f32 %v5418_v6, %v1678_v20  ;;  %v1837_v23 = vadd.f32 %v4057_v40, %v1815_v62  ;;  %v2022_v26 = vadd.f32 %v2006_v45, %v1986_v59  ;;  %v5491_v45 = vld [vmem:[#allocation43_spill] sm:$0xff] }
 0x18c   : > { %5482 = vst [vmem:[#allocation45_spill] sm:$0xff] %v4764_v60  ;;  %v4772_v57 = vsel %vm1043_vm1, %v5484_v3, %v5483_v17  ;;  %v4780_v28 = vmul.f32 %v3439_v19, %v4560_v8  ;;  %v2113_v1 = vmul.f32 %v4486_v37, %v1760_v51  ;;  %v5486_v60 = vld [vmem:[#allocation41_spill] sm:$0xff]  ;;  %v4786_v33 = vmul.f32 %v5375_v27, %v4560_v8 }
 0x18d   : > { %v1899_v15 = vadd.f32 %v5485_v2, %v1863_v55  ;;  %v2093_v35 = vadd.f32 %v2077_v32, %v2057_v30  ;;  %v2147_v17 = vmul.f32 0.044715, %v5486_v60  ;;  %v1818_v20 = vmul.f32 %v5413_v25, %v4772_v57 }
 0x18e   : > { %5487 = vst [vmem:[#allocation46_spill] sm:$0xff] %v4786_v33  ;;  %v4791_v62 = vadd.f32 %v2042_v42, %v2022_v26  ;;  %v5489_v19 = vrot.slane %v4279_v52, 1  ;;  %v5490_v12 = vrot.slane %v4199_v34, 1  ;;  %v2148_v3 = vmul.f32 0.044715, %v5491_v45 }
 0x18f   : > { %v1935_v59 = vadd.f32 %v4247_v63, %v1899_v15  ;;  %v4793_v54 = vadd.f32 %v2113_v1, %v2093_v35  ;;  %v2163_v51 = vmul.f32 %v2147_v17, %v5486_v60  ;;  %v4804_v30 = vadd.f32 %v4587_v44, %v1837_v23  ;;  %v5494_v17 = vld [vmem:[#allocation44_spill] sm:$0xff] }
 0x190   : > { %v1774_v55 = vsel %vm1108_vm2, %v5490_v12, %v5489_v19  ;;  %v4808_v63 = vmul.f32 %v5418_v6, %v4560_v8  ;;  %v4812_v1 = vmul.f32 %v5375_v27, %v4548_v39  ;;  %v4816_v34 = vmul.f32 %v5418_v6, %v4548_v39 }
 0x191   : > { %5488 = vst [vmem:[#allocation41_spill] sm:$0xff] %v4793_v54  ;;  %v4820_v52 = vmul.f32 %v5394_v53, %v4772_v57  ;;  %v1971_v25 = vadd.f32 %v4268_v24, %v1935_v59  ;;  %v2179_v44 = vmul.f32 %v2163_v51, %v5486_v60  ;;  %v2164_v15 = vmul.f32 %v2148_v3, %v5491_v45  ;;  %v5509_v54 = vld [vmem:[#allocation16_spill] sm:$0xff] }
 0x192   : > { %5492 = vst [vmem:[#allocation43_spill] sm:$0xff] %v4808_v63  ;;  %v4826_v26 = vadd.f32 %v4057_v40, %v1818_v20  ;;  %v4830_v35 = vmul.f32 %v5394_v53, %v4608_v56  ;;  %v4834_v42 = vmul.f32 %v5375_v27, %v4576_v38  ;;  %v1993_v32 = vmul.f32 %v5408_v31, %v1774_v55 }
 0x193   : > { %v5493_v23 = vrot.slane %v5476_v50, 1  ;;  %v2195_v2 = vadd.f32 %v2179_v44, %v5486_v60  ;;  %v2180_v40 = vmul.f32 %v2164_v15, %v5491_v45  ;;  %v2149_v20 = vmul.f32 0.044715, %v5494_v17 }
 0x194   : > { %v4846_v59 = vmul.f32 %v5394_v53, %v4637_v61  ;;  %v4850_v27 = vmul.f32 %v5418_v6, %v4616_v4  ;;  %v4854_v50 = vmul.f32 %v5408_v31, %v4686_v43  ;;  %v2007_v19 = vadd.f32 %v4303_v11, %v1971_v25  ;;  %v5511_v43 = vld [vmem:[#allocation10_spill] sm:$0xff]  ;;  %v5513_v61 = vld [vmem:[#allocation12_spill] sm:$0xff] }
 0x195   : > { %v1779_v24 = vsel %vm1108_vm2, %v1759_v58, %v5493_v23  ;;  %v2009_v58 = vadd.f32 %v1993_v32, %v4416_v41  ;;  %v2211_v12 = vmul.f32 0.7978846, %v2195_v2  ;;  %v2196_v51 = vadd.f32 %v2180_v40, %v5491_v45 }
 0x196   : > { %v2165_v3 = vmul.f32 %v2149_v20, %v5494_v17  ;;  %v4862_v53 = vmul.f32 %v5430_v18, %v4682_v7  ;;  %v1799_v4 = vsel %vm761_vm5, 0.0, %v1779_v24  ;;  %v2027_v44 = vmul.f32 %v5430_v18, %v4318_v10 }
 0x197   : > { %v2029_v41 = vmul.f32 %v5430_v18, %v4397_v21  ;;  %3002 = vtanh.f32 %v2211_v12  ;;  %v2212_v11 = vmul.f32 0.7978846, %v2196_v51  ;;  %v1902_v15 = vadd.f32 %v4389_v22, %v4299_v48  ;;  %v5500_v12 = vld [vmem:[#allocation47_spill] sm:$0xff] }
 0x198   : > { %v2181_v25 = vmul.f32 %v2165_v3, %v5494_v17  ;;  %v1887_v32 = vmul.f32 %v5424_v14, %v1774_v55  ;;  %v2080_v7 = vadd.f32 %v4364_v13, %v4436_v9  ;;  %v5495_v23 = vrot.slane %v4355_v0, 1  ;;  %v5502_v0 = vld [vmem:[#allocation60_spill] sm:$0xff] }
 0x199   : > { %v5496_v24 = vrot.slane %v4337_v46, 1  ;;  %v2045_v21 = vadd.f32 %v2029_v41, %v2009_v58  ;;  %v2043_v2 = vadd.f32 %v2027_v44, %v2007_v19  ;;  %3004 = vtanh.f32 %v2212_v11  ;;  %v5501_v44 = vld [vmem:[#allocation5_spill] sm:$0xff] }
 0x19a   : > { %v2197_v40 = vadd.f32 %v2181_v25, %v5494_v17  ;;  %v5497_v20 = vrot.slane %v4378_v47, 1  ;;  %v5498_v48 = vmov %v5495_v23  ;;  %v4890_v13 = vmul.f32 %v4486_v37, %v1799_v4 }
 0x19b   : > { %v1772_v10 = vsel %vm1108_vm2, %v5496_v24, %v5495_v23  ;;  %v1903_v46 = vadd.f32 %v1887_v32, %v4414_v36  ;;  %v2099_v9 = vmul.f32 %v4486_v37, %v1774_v55  ;;  %v2150_v58 = vmul.f32 0.044715, %v5500_v12  ;;  %v5503_v55 = vld [vmem:[#allocation7_spill] sm:$0xff] }
 0x19c   : > { %v1771_v22 = vsel %vm1108_vm2, %v5498_v48, %v5497_v20  ;;  %5499 = vst [vmem:[#allocation44_spill] sm:$0xff] %v4890_v13  ;;  %v2131_v19 = vmul.f32 0.5, %v5486_v60  ;;  %v2132_v51 = vmul.f32 0.5, %v5491_v45  ;;  %v2213_v3 = vmul.f32 0.7978846, %v2197_v40  ;;  %v5504_v60 = vld [vmem:[#allocation50_spill] sm:$0xff] }
 0x19d   : > { %v1938_v41 = vadd.f32 %v5501_v44, %v1902_v15  ;;  %v4899_v11 = vadd.f32 %v5502_v0, %v2080_v7  ;;  %v1889_v25 = vmul.f32 %v5424_v14, %v1772_v10  ;;  %v1787_v4 = vsel %vm761_vm5, 0.0, %v1771_v22  ;;  %v5505_v7 = vld [vmem:[#allocation52_spill] sm:$0xff]  ;;  %v5507_v44 = vld [vmem:[#allocation55_spill] sm:$0xff] }
 0x19e   : > { %v2166_v36 = vmul.f32 %v2150_v58, %v5500_v12  ;;  %v2079_v32 = vadd.f32 %v5503_v55, %v2043_v2  ;;  %v1995_v23 = vmul.f32 %v5408_v31, %v1772_v10  ;;  %v2081_v24 = vadd.f32 %v5504_v60, %v2045_v21  ;;  %v5506_v20 = vld [vmem:[#allocation48_spill] sm:$0xff]  ;;  %v5508_v0 = vld [vmem:[#allocation3_spill] sm:$0xff] }
 0x19f   : > { %3006 = vtanh.f32 %v2213_v3  ;;  %v2101_v45 = vmul.f32 %v4486_v37, %v1772_v10  ;;  %v1939_v40 = vadd.f32 %v5505_v7, %v1903_v46  ;;  %v2151_v48 = vmul.f32 0.044715, %v5506_v20  ;;  %v5510_v55 = vld [vmem:[#allocation28_spill] sm:$0xff]  ;;  %v5512_v21 = vld [vmem:[#allocation63_spill] sm:$0xff] }
 0x1a0   : > { %v2182_v15 = vmul.f32 %v2166_v36, %v5500_v12  ;;  %v1870_v22 = vadd.f32 %v5508_v0, %v5507_v44  ;;  %v1890_v58 = vmul.f32 %v5424_v14, %v1787_v4  ;;  %v1974_v2 = vadd.f32 %v5509_v54, %v1938_v41  ;;  %v5514_v0 = vld [vmem:[#allocation59_spill] sm:$0xff] }
 0x1a1   : > { %v1868_v38 = vadd.f32 %v5511_v43, %v5510_v55  ;;  %v1905_v3 = vadd.f32 %v1889_v25, %v5512_v21  ;;  %v2133_v10 = vmul.f32 0.5, %v5494_v17  ;;  %v2167_v46 = vmul.f32 %v2151_v48, %v5506_v20  ;;  %v5515_v43 = vld [vmem:[#allocation49_spill] sm:$0xff] }
 0x1a2   : > { %v2198_v36 = vadd.f32 %v2182_v15, %v5500_v12  ;;  %v2115_v60 = vadd.f32 %v2099_v9, %v2079_v32  ;;  %v2117_v7 = vadd.f32 %v2101_v45, %v2081_v24  ;;  %v1994_v44 = vmul.f32 %v5408_v31, %v5513_v61  ;;  %v5516_v15 = vld [vmem:[#allocation4_spill] sm:$0xff]  ;;  %v5517_v61 = vld [vmem:[#allocation9_spill] sm:$0xff] }
 0x1a3   : > { %v1904_v6 = vadd.f32 %v5514_v0, %v1868_v38  ;;  %v1996_v54 = vmul.f32 %v5408_v31, %v1787_v4  ;;  %v1975_v55 = vadd.f32 %v5515_v43, %v1939_v40  ;;  %v2183_v25 = vmul.f32 %v2167_v46, %v5506_v20  ;;  %v5521_v46 = vld [vmem:[#allocation58_spill] sm:$0xff] }
 0x1a4   : > { %v2214_v41 = vmul.f32 0.7978846, %v2198_v36  ;;  %v4928_v21 = vadd.f32 %v1890_v58, %v1870_v22  ;;  %v2010_v17 = vadd.f32 %v1994_v44, %v1974_v2  ;;  %v2030_v48 = vmul.f32 %v5430_v18, %v5516_v15  ;;  %v3003_v32 = vpop.eup %3002  ;;  %v5520_v36 = vld [vmem:[#allocation21_spill] sm:$0xff] }
 0x1a5   : > { %v2102_v9 = vmul.f32 %v4486_v37, %v1787_v4  ;;  %v5518_v24 = vrot.slane %v5517_v61, 1  ;;  %v5519_v38 = vrot.slane %v4378_v47, 1  ;;  %v2199_v40 = vadd.f32 %v2183_v25, %v5506_v20 }
 0x1a6   : > { %3008 = vtanh.f32 %v2214_v41  ;;  %v2152_v22 = vmul.f32 0.044715, %v5520_v36  ;;  %v2243_v58 = vadd.f32 1.0, %v3003_v32  ;;  %v4942_v2 = vmul.f32 0.5, %v5500_v12  ;;  %v5524_v41 = vld [vmem:[#allocation53_spill] sm:$0xff]  ;;  %v3005_v43 = vpop.eup %3004 }
 0x1a7   : > { %v1770_v45 = vsel %vm1108_vm2, %v5519_v38, %v5518_v24  ;;  %v5522_v44 = vrot.slane %v5521_v46, 1  ;;  %v5523_v4 = vmov %v5518_v24  ;;  %v1940_v47 = vadd.f32 %v5524_v41, %v1904_v6  ;;  %v5525_v24 = vld [vmem:[#allocation54_spill] sm:$0xff] }
 0x1a8   : > { %v2011_v15 = vadd.f32 %v1995_v23, %v1975_v55  ;;  %v2031_v25 = vmul.f32 %v5430_v18, %v5525_v24  ;;  %v2215_v38 = vmul.f32 0.7978846, %v2199_v40  ;;  %v2168_v32 = vmul.f32 %v2152_v22, %v5520_v36  ;;  %v5527_v40 = vld [vmem:[#allocation67_spill] sm:$0xff] }
 0x1a9   : > { %v1769_v0 = vsel %vm1108_vm2, %v5523_v4, %v5522_v44  ;;  %v2259_v63 = vmul.f32 %v2243_v58, %v2131_v19  ;;  %v2244_v12 = vadd.f32 1.0, %v3005_v43  ;;  %v2046_v33 = vadd.f32 %v2030_v48, %v2010_v17  ;;  %v5526_v4 = vld [vmem:[#allocation14_spill] sm:$0xff] }
 0x1aa   : > { %v1891_v13 = vmul.f32 %v5424_v14, %v1770_v45  ;;  %v1997_v61 = vmul.f32 %v5408_v31, %v1770_v45  ;;  %3010 = vtanh.f32 %v2215_v38  ;;  %v1789_v44 = vsel %vm761_vm5, 0.0, %v1769_v0  ;;  %v5528_v58 = vld [vmem:[#allocation22_spill] sm:$0xff] }
 0x1ab   : > { %v2184_v6 = vmul.f32 %v2168_v32, %v5520_v36  ;;  %v2275_v23 = vmul.f32 %v2259_v63, %v2115_v60  ;;  %v2260_v55 = vmul.f32 %v2244_v12, %v2132_v51  ;;  %v1976_v41 = vadd.f32 %v5526_v4, %v1940_v47  ;;  %v5529_v32 = vld [vmem:[#allocation6_spill] sm:$0xff]  ;;  %v5530_v60 = vld [vmem:[#allocation68_spill] sm:$0xff] }
 0x1ac   : > { %v1941_v24 = vadd.f32 %v5527_v40, %v1905_v3  ;;  %v3007_v22 = vpop.eup %3006  ;;  %v2047_v19 = vadd.f32 %v2031_v25, %v2011_v15  ;;  %v2103_v17 = vmul.f32 %v4486_v37, %v1770_v45  ;;  %v2153_v43 = vmul.f32 0.044715, %v5528_v58  ;;  %v5531_v47 = vld [vmem:[#allocation56_spill] sm:$0xff] }
 0x1ad   : > { %v2200_v48 = vadd.f32 %v2184_v6, %v5520_v36  ;;  %2930 = vmatprep.mubr.msk.f32.mxu0 %vm2306_vm7, %v2275_v23  ;;  %v2276_v0 = vmul.f32 %v2260_v55, %v4899_v11  ;;  %v2245_v38 = vadd.f32 1.0, %v3007_v22  ;;  %v2082_v63 = vadd.f32 %v5529_v32, %v2046_v33  ;;  %v5532_v23 = vld [vmem:[#allocation65_spill] sm:$0xff]  ;;  %v5533_v11 = vld [vmem:[#allocation20_spill] sm:$0xff]  ;;  %v5534_v55 = vld [vmem:[#allocation15_spill] sm:$0xff] }
 0x1ae   : > { %v2135_v51 = vmul.f32 0.5, %v5506_v20  ;;  %v1872_v3 = vadd.f32 %v5531_v47, %v5530_v60  ;;  %v1892_v15 = vmul.f32 %v5424_v14, %v1789_v44  ;;  %v2169_v45 = vmul.f32 %v2153_v43, %v5528_v58  ;;  %v5535_v33 = vld [vmem:[#allocation77_spill] sm:$0xff]  ;;  %v5536_v22 = vld [vmem:[#allocation66_spill] sm:$0xff]  ;;  %v5537_v43 = vld [vmem:[#allocation51_spill] sm:$0xff] }
 0x1af   : > { %v2216_v25 = vmul.f32 0.7978846, %v2200_v48  ;;  %2931 = vmatmul.mubr.msk.f32.vlgmr.msra.gmra.mxu0 %vm2306_vm7, %v2276_v0  ;;  %v2261_v12 = vmul.f32 %v2245_v38, %v2133_v10  ;;  %v2012_v6 = vadd.f32 %v1996_v54, %v1976_v41  ;;  %v1977_v4 = vadd.f32 %v5532_v23, %v1941_v24  ;;  %v5538_v10 = vld [vmem:[#allocation57_spill] sm:$0xff] }
 0x1b0   : > { %v4976_v40 = vadd.f32 %v5534_v55, %v5533_v11  ;;  %v1907_v20 = vadd.f32 %v1891_v13, %v5535_v33  ;;  %v2083_v32 = vadd.f32 %v5536_v22, %v2047_v19  ;;  %v2185_v60 = vmul.f32 %v2169_v45, %v5528_v58  ;;  %v5543_v22 = vld [vmem:[#allocation8_spill] sm:$0xff] }
 0x1b1   : > { %3012 = vtanh.f32 %v2216_v25  ;;  %v2277_v48 = vmul.f32 %v2261_v12, %v2117_v7  ;;  %v2118_v47 = vadd.f32 %v2102_v9, %v2082_v63  ;;  %v2032_v0 = vmul.f32 %v5430_v18, %v5537_v43 }
 0x1b2   : > { %v5539_v54 = vrot.slane %v5538_v10, 1  ;;  %v5540_v41 = vrot.slane %v5521_v46, 1  ;;  %v4989_v38 = vadd.f32 %v1892_v15, %v1872_v3  ;;  %v1998_v13 = vmul.f32 %v5408_v31, %v1789_v44 }
 0x1b3   : > { %v2104_v19 = vmul.f32 %v4486_v37, %v1789_v44  ;;  %v2201_v25 = vadd.f32 %v2185_v60, %v5528_v58  ;;  %v3009_v7 = vpop.eup %3008  ;;  %2933 = vmatprep.mubr.msk.f32.mxu0 %vm2306_vm7, %v2277_v48  ;;  %v2048_v9 = vadd.f32 %v2032_v0, %v2012_v6  ;;  %v2136_v63 = vmul.f32 0.5, %v5520_v36  ;;  %v5541_v44 = vld [vmem:[#allocation64_spill] sm:$0xff]  ;;  %v5545_v48 = vld [vmem:[#allocation62_spill] sm:$0xff] }
 0x1b4   : > { %v1768_v24 = vsel %vm1108_vm2, %v5540_v41, %v5539_v54  ;;  %v2013_v45 = vadd.f32 %v1997_v61, %v1977_v4  ;;  %v2154_v46 = vmul.f32 0.044715, %v4976_v40  ;;  %v2246_v12 = vadd.f32 1.0, %v3009_v7  ;;  %v5542_v61 = vld [vmem:[#allocation24_spill] sm:$0xff] }
 0x1b5   : > { %v2119_v23 = vadd.f32 %v2103_v17, %v2083_v32  ;;  %v1893_v3 = vmul.f32 %v5424_v14, %v1768_v24  ;;  %v2217_v15 = vmul.f32 0.7978846, %v2201_v25  ;;  %v2033_v11 = vmul.f32 %v5430_v18, %v4716_v49  ;;  %v5544_v17 = vld [vmem:[#allocation13_spill] sm:$0xff]  ;;  %v5548_v25 = vld [vmem:[#allocation31_spill] sm:$0xff] }
 0x1b6   : > { %v1942_v55 = vadd.f32 %v5541_v44, %v4928_v21  ;;  %v2170_v33 = vmul.f32 %v2154_v46, %v4976_v40  ;;  %v1943_v6 = vadd.f32 %v4756_v5, %v1907_v20  ;;  %v2262_v36 = vmul.f32 %v2246_v12, %v4942_v2  ;;  %v5550_v12 = vld [vmem:[#allocation75_spill] sm:$0xff] }
 0x1b7   : > { %3014 = vtanh.f32 %v2217_v15  ;;  %v2155_v4 = vmul.f32 0.044715, %v5542_v61  ;;  %v1441_v32 = vadd.f32 %v5544_v17, %v5543_v22  ;;  %v3011_v60 = vpop.eup %3010  ;;  %v2084_v43 = vadd.f32 %v5545_v48, %v2048_v9  ;;  %v5549_v9 = vld [vmem:[#allocation61_spill] sm:$0xff]  ;;  %v5551_v17 = vld [vmem:[#allocation76_spill] sm:$0xff] }
 0x1b8   : > { %v2049_v0 = vadd.f32 %v2033_v11, %v2013_v45  ;;  %v5546_v49 = vrot.slane %v4548_v39, 1  ;;  %v5547_v21 = vmov %v5539_v54  ;;  %v2186_v5 = vmul.f32 %v2170_v33, %v4976_v40 }
 0x1b9   : > { %v2278_v2 = vmul.f32 %v2262_v36, %v2118_v47  ;;  %v2247_v20 = vadd.f32 1.0, %v3011_v60  ;;  %v2171_v41 = vmul.f32 %v2155_v4, %v5542_v61  ;;  %v5018_v7 = vadd.f32 %v5548_v25, %v1441_v32  ;;  %v5553_v60 = vld [vmem:[#allocation69_spill] sm:$0xff] }
 0x1ba   : > { %v1767_v54 = vsel %vm1108_vm2, %v5547_v21, %v5546_v49  ;;  %v1999_v46 = vmul.f32 %v5408_v31, %v1768_v24  ;;  %v1978_v45 = vadd.f32 %v5549_v9, %v1942_v55  ;;  %v2202_v39 = vadd.f32 %v2186_v5, %v4976_v40  ;;  %v5554_v49 = vld [vmem:[#allocation73_spill] sm:$0xff]  ;;  %v5557_v5 = vld [vmem:[#allocation74_spill] sm:$0xff] }
 0x1bb   : > { %v1979_v10 = vadd.f32 %v5550_v12, %v1943_v6  ;;  %2934 = vmatmul.mubr.msk.f32.gmra.mxu0 %vm2306_vm7, %v2278_v2  ;;  %v2263_v15 = vmul.f32 %v2247_v20, %v2135_v51  ;;  %v1909_v11 = vadd.f32 %v1893_v3, %v4804_v30  ;;  %v2105_v47 = vmul.f32 %v4486_v37, %v1768_v24  ;;  %v5552_v6 = vld [vmem:[#allocation45_spill] sm:$0xff] }
 0x1bc   : > { %v2187_v44 = vmul.f32 %v2171_v41, %v5542_v61  ;;  %v2120_v33 = vadd.f32 %v2104_v19, %v2084_v43  ;;  %v2137_v36 = vmul.f32 0.5, %v5528_v58  ;;  %v1791_v4 = vsel %vm761_vm5, 0.0, %v1767_v54  ;;  %v5559_v41 = vld [vmem:[#allocation30_spill] sm:$0xff] }
 0x1bd   : > { %v2218_v55 = vmul.f32 0.7978846, %v2202_v39  ;;  %v2279_v22 = vmul.f32 %v2263_v15, %v2119_v23  ;;  %v2085_v32 = vadd.f32 %v5551_v17, %v2049_v0  ;;  %v1874_v48 = vadd.f32 %v5553_v60, %v5552_v6  ;;  %v5562_v17 = vld [vmem:[#allocation23_spill] sm:$0xff] }
 0x1be   : > { %v2203_v51 = vadd.f32 %v2187_v44, %v5542_v61  ;;  %v3013_v30 = vpop.eup %3012  ;;  %v2014_v3 = vadd.f32 %v1998_v13, %v1978_v45  ;;  %v2015_v24 = vadd.f32 %v1999_v46, %v1979_v10  ;;  %v5555_v19 = vrot.slane %v5554_v49, 1  ;;  %v5560_v10 = vld [vmem:[#allocation32_spill] sm:$0xff] }
 0x1bf   : > { %3016 = vtanh.f32 %v2218_v55  ;;  %v5556_v58 = vrot.slane %v4560_v8, 1  ;;  %2936 = vmatprep.mubr.msk.f32.mxu0 %vm2306_vm7, %v2279_v22  ;;  %v2248_v23 = vadd.f32 1.0, %v3013_v30  ;;  %v1894_v0 = vmul.f32 %v5424_v14, %v1791_v4  ;;  %v5558_v8 = vld [vmem:[#allocation18_spill] sm:$0xff]  ;;  %v5561_v55 = vld [vmem:[#allocation84_spill] sm:$0xff]  ;;  %v5564_v30 = vld [vmem:[#allocation29_spill] sm:$0xff] }
 0x1c0   : > { %v2000_v21 = vmul.f32 %v5408_v31, %v1791_v4  ;;  %v2219_v54 = vmul.f32 0.7978846, %v2203_v51  ;;  %v2034_v13 = vmul.f32 %v5430_v18, %v5557_v5  ;;  %v2035_v2 = vmul.f32 %v5430_v18, %v4608_v56 }
 0x1c1   : > { %v1765_v43 = vsel %vm1108_vm2, %v5556_v58, %v5555_v19  ;;  %v2156_v20 = vmul.f32 0.044715, %v5018_v7  ;;  %v1442_v29 = vadd.f32 %v5559_v41, %v5558_v8  ;;  %v2264_v25 = vmul.f32 %v2248_v23, %v2136_v63  ;;  %v5563_v63 = vld [vmem:[#allocation26_spill] sm:$0xff]  ;;  %v5570_v8 = vld [vmem:[#allocation27_spill] sm:$0xff] }
 0x1c2   : > { %v2121_v46 = vadd.f32 %v2105_v47, %v2085_v32  ;;  %3018 = vtanh.f32 %v2219_v54  ;;  %v5053_v9 = vsel %vm761_vm5, 0.0, %v1765_v43  ;;  %v2050_v45 = vadd.f32 %v2034_v13, %v2014_v3  ;;  %v5566_v58 = vld [vmem:[#allocation78_spill] sm:$0xff]  ;;  %v5568_v54 = vld [vmem:[#allocation19_spill] sm:$0xff] }
 0x1c3   : > { %v2051_v39 = vadd.f32 %v2035_v2, %v2015_v24  ;;  %v2172_v12 = vmul.f32 %v2156_v20, %v5018_v7  ;;  %v5057_v15 = vadd.f32 %v5560_v10, %v1442_v29  ;;  %v2280_v56 = vmul.f32 %v2264_v25, %v2120_v33  ;;  %v5565_v24 = vld [vmem:[#allocation71_spill] sm:$0xff]  ;;  %v5567_v43 = vld [vmem:[#allocation70_spill] sm:$0xff]  ;;  %v5569_v20 = vld [vmem:[#allocation17_spill] sm:$0xff] }
 0x1c4   : > { %v1910_v44 = vadd.f32 %v1894_v0, %v1874_v48  ;;  %v1944_v22 = vadd.f32 %v5561_v55, %v4989_v38  ;;  %v1371_v47 = vadd.f32 %v5563_v63, %v5562_v17  ;;  %v3015_v32 = vpop.eup %3014  ;;  %v2106_v16 = vmul.f32 %v4486_v37, %v1791_v4  ;;  %v5572_v10 = vld [vmem:[#allocation33_spill] sm:$0xff]  ;;  %v5573_v63 = vld [vmem:[#allocation34_spill] sm:$0xff] }
 0x1c5   : > { %v1876_v6 = vadd.f32 %v4780_v28, %v4826_v26  ;;  %v1896_v60 = vmul.f32 %v5424_v14, %v5053_v9  ;;  %v2188_v51 = vmul.f32 %v2172_v12, %v5018_v7  ;;  %2937 = vmatmul.mubr.msk.f32.gmra.mxu0 %vm2306_vm7, %v2280_v56  ;;  %v2249_v33 = vadd.f32 1.0, %v3015_v32 }
 0x1c6   : > { %v2138_v48 = vmul.f32 0.5, %v4976_v40  ;;  %v2157_v38 = vmul.f32 0.044715, %v5057_v15  ;;  %v1407_v3 = vadd.f32 %v5564_v30, %v1371_v47  ;;  %v2086_v19 = vadd.f32 %v5565_v24, %v2050_v45  ;;  %v5571_v45 = vld [vmem:[#allocation38_spill] sm:$0xff]  ;;  %v5576_v24 = vld [vmem:[#allocation35_spill] sm:$0xff] }
 0x1c7   : > { %v2087_v4 = vadd.f32 %v4816_v34, %v2051_v39  ;;  %v2107_v28 = vmul.f32 %v4486_v37, %v5566_v58  ;;  %v2204_v14 = vadd.f32 %v2188_v51, %v5018_v7  ;;  %v2265_v26 = vmul.f32 %v2249_v33, %v2137_v36 }
 0x1c8   : > { %v1980_v23 = vadd.f32 %v5567_v43, %v1944_v22  ;;  %v2173_v0 = vmul.f32 %v2157_v38, %v5057_v15  ;;  %v1443_v40 = vadd.f32 %v5568_v54, %v1407_v3  ;;  %v2139_v5 = vmul.f32 0.5, %v5542_v61  ;;  %v5575_v38 = vld [vmem:[#allocation39_spill] sm:$0xff] }
 0x1c9   : > { %v1912_v13 = vadd.f32 %v1896_v60, %v1876_v6  ;;  %v2220_v2 = vmul.f32 0.7978846, %v2204_v14  ;;  %v1372_v41 = vadd.f32 %v5570_v8, %v5569_v20  ;;  %v2281_v34 = vmul.f32 %v2265_v26, %v2121_v46  ;;  %v5574_v6 = vld [vmem:[#allocation80_spill] sm:$0xff] }
 0x1ca   : > { %v1945_v29 = vadd.f32 %v4830_v35, %v1909_v11  ;;  %v2189_v25 = vmul.f32 %v2173_v0, %v5057_v15  ;;  %v5087_v36 = vadd.f32 %v5571_v45, %v1443_v40  ;;  %v2122_v39 = vadd.f32 %v2106_v16, %v2086_v19  ;;  %v5578_v0 = vld [vmem:[#allocation42_spill] sm:$0xff]  ;;  %v5581_v45 = vld [vmem:[#allocation37_spill] sm:$0xff] }
 0x1cb   : > { %v2123_v12 = vadd.f32 %v2107_v28, %v2087_v4  ;;  %3020 = vtanh.f32 %v2220_v2  ;;  %v1408_v56 = vadd.f32 %v5572_v10, %v1372_v41  ;;  %2939 = vmatprep.mubr.msk.f32.mxu0 %vm2306_vm7, %v2281_v34  ;;  %v2016_v61 = vadd.f32 %v2000_v21, %v1980_v23 }
 0x1cc   : > { %v3017_v55 = vpop.eup %3016  ;;  %v2036_v22 = vmul.f32 %v5430_v18, %v4772_v57  ;;  %v2205_v46 = vadd.f32 %v2189_v25, %v5057_v15  ;;  %v2158_v35 = vmul.f32 0.044715, %v5087_v36  ;;  %v2001_v17 = vmul.f32 %v5408_v31, %v5566_v58 }
 0x1cd   : > { %v2250_v11 = vadd.f32 1.0, %v3017_v55  ;;  %v1444_v47 = vadd.f32 %v5573_v63, %v1408_v56  ;;  %v1948_v32 = vadd.f32 %v4846_v59, %v1912_v13  ;;  %v1981_v16 = vadd.f32 %v4812_v1, %v1945_v29  ;;  %v5580_v29 = vld [vmem:[#allocation44_spill] sm:$0xff]  ;;  %v5583_v55 = vld [vmem:[#allocation43_spill] sm:$0xff] }
 0x1ce   : > { %v2037_v21 = vmul.f32 %v5430_v18, %v5574_v6  ;;  %v2221_v60 = vmul.f32 0.7978846, %v2205_v46  ;;  %v2174_v57 = vmul.f32 %v2158_v35, %v5087_v36  ;;  %v2160_v19 = vmul.f32 0.044715, %v5576_v24 }
 0x1cf   : > { %v3019_v51 = vpop.eup %3018  ;;  %v2266_v33 = vmul.f32 %v2250_v11, %v2138_v48  ;;  %v5104_v30 = vadd.f32 %v5575_v38, %v1444_v47  ;;  %v1984_v3 = vadd.f32 %v4834_v42, %v1948_v32  ;;  %v2052_v58 = vadd.f32 %v2036_v22, %v2016_v61  ;;  %v5577_v42 = vld [vmem:[#allocation36_spill] sm:$0xff] }
 0x1d0   : > { %v2251_v4 = vadd.f32 1.0, %v3019_v51  ;;  %3022 = vtanh.f32 %v2221_v60  ;;  %v2190_v1 = vmul.f32 %v2174_v57, %v5087_v36  ;;  %v1946_v28 = vadd.f32 %v4820_v52, %v1910_v44  ;;  %v5579_v52 = vld [vmem:[#allocation25_spill] sm:$0xff] }
 0x1d1   : > { %v2282_v59 = vmul.f32 %v2266_v33, %v2122_v39  ;;  %v2159_v14 = vmul.f32 0.044715, %v5104_v30  ;;  %v2020_v26 = vadd.f32 %v4854_v50, %v1984_v3  ;;  %v2176_v23 = vmul.f32 %v2160_v19, %v5576_v24 }
 0x1d2   : > { %v2267_v48 = vmul.f32 %v2251_v4, %v2139_v5  ;;  %v2206_v43 = vadd.f32 %v2190_v1, %v5087_v36  ;;  %v2177_v54 = vmul.f32 %v5578_v0, %v5577_v42  ;;  %v2017_v40 = vadd.f32 %v2001_v17, %v1981_v16 }
 0x1d3   : > { %2940 = vmatmul.mubr.msk.f32.gmra.mxu0 %vm2306_vm7, %v2282_v59  ;;  %v2175_v13 = vmul.f32 %v2159_v14, %v5104_v30  ;;  %v2056_v2 = vadd.f32 %v4862_v53, %v2020_v26  ;;  %v2094_v44 = vadd.f32 %v5579_v52, %v4791_v62  ;;  %v2192_v5 = vmul.f32 %v2176_v23, %v5576_v24  ;;  %v5582_v53 = vld [vmem:[#allocation46_spill] sm:$0xff]  ;;  %v5587_v14 = vld [vmem:[#allocation72_spill] sm:$0xff] }
 0x1d4   : > { %v2283_v20 = vmul.f32 %v2267_v48, %v2123_v12  ;;  %v2222_v50 = vmul.f32 0.7978846, %v2206_v43  ;;  %v2193_v8 = vmul.f32 %v2177_v54, %v5577_v42  ;;  %v2162_v39 = vmul.f32 0.044715, %v5581_v45  ;;  %v5588_v54 = vld [vmem:[#allocation82_spill] sm:$0xff] }
 0x1d5   : > { %v2191_v41 = vmul.f32 %v2175_v13, %v5104_v30  ;;  %v2092_v34 = vadd.f32 %v4850_v27, %v2056_v2  ;;  %v5126_v25 = vadd.f32 %v5580_v29, %v2094_v44  ;;  %v1982_v10 = vadd.f32 %v5582_v53, %v1946_v28  ;;  %v5589_v2 = vld [vmem:[#allocation85_spill] sm:$0xff] }
 0x1d6   : > { %2942 = vmatprep.mubr.msk.f32.mxu0 %vm2306_vm7, %v2283_v20  ;;  %3024 = vtanh.f32 %v2222_v50  ;;  %v2208_v62 = vadd.f32 %v2192_v5, %v5576_v24  ;;  %v2209_v12 = vadd.f32 %v2193_v8, %v5577_v42  ;;  %v2002_v56 = vmul.f32 %v5408_v31, %v5053_v9  ;;  %v5584_v31 = vld [vmem:[#allocation11_spill] sm:$0xff] }
 0x1d7   : > { %v2088_v61 = vadd.f32 %v5583_v55, %v2052_v58  ;;  %v2207_v27 = vadd.f32 %v2191_v41, %v5104_v30  ;;  %v2178_v22 = vmul.f32 %v2162_v39, %v5581_v45  ;;  %v2108_v35 = vmul.f32 %v4486_v37, %v5053_v9  ;;  %v5586_v58 = vld [vmem:[#allocation81_spill] sm:$0xff] }
 0x1d8   : > { %v3021_v46 = vpop.eup %3020  ;;  %v2053_v11 = vadd.f32 %v2037_v21, %v2017_v40  ;;  %v2224_v17 = vmul.f32 0.7978846, %v2208_v62  ;;  %v2225_v63 = vmul.f32 0.7978846, %v2209_v12  ;;  %v2140_v47 = vmul.f32 0.5, %v5018_v7  ;;  %v5585_v21 = vld [vmem:[#allocation79_spill] sm:$0xff] }
 0x1d9   : > { %v2252_v32 = vadd.f32 1.0, %v3021_v46  ;;  %v2223_v16 = vmul.f32 0.7978846, %v2207_v27  ;;  %v2194_v6 = vmul.f32 %v2178_v22, %v5581_v45  ;;  %v2073_v60 = vmul.f32 %v5584_v31, %v5554_v49  ;;  %v5591_v27 = vld [vmem:[#allocation40_spill] sm:$0xff] }
 0x1da   : > { %v2018_v57 = vadd.f32 %v2002_v56, %v1982_v10  ;;  %3026 = vtanh.f32 %v2224_v17  ;;  %v2124_v51 = vadd.f32 %v2108_v35, %v2088_v61  ;;  %v2038_v3 = vmul.f32 %v5430_v18, %v5585_v21  ;;  %v5590_v10 = vld [vmem:[#allocation83_spill] sm:$0xff] }
 0x1db   : > { %v2268_v33 = vmul.f32 %v2252_v32, %v2140_v47  ;;  %3028 = vtanh.f32 %v2223_v16  ;;  %v2210_v38 = vadd.f32 %v2194_v6, %v5581_v45  ;;  %v2089_v9 = vadd.f32 %v2073_v60, %v2053_v11  ;;  %v2739_v32 = vld [vmem:[%s5226_s12] ss:$0 sm:$0xff] }
 0x1dc   : > { %3030 = vtanh.f32 %v2225_v63  ;;  %v2109_v1 = vmul.f32 %v4486_v37, %v5586_v58  ;;  %v2141_v49 = vmul.f32 0.5, %v5057_v15  ;;  %v2054_v28 = vadd.f32 %v2038_v3, %v2018_v57  ;;  %v5592_v63 = vld [vmem:[#allocation41_spill] sm:$0xff] }
 0x1dd   : > { %v3023_v7 = vpop.eup %3022  ;;  %v2284_v19 = vmul.f32 %v2268_v33, %v2124_v51  ;;  %v2226_v4 = vmul.f32 0.7978846, %v2210_v38  ;;  %v2074_v26 = vmul.f32 %v5584_v31, %v5587_v14  ;;  %v2110_v40 = vmul.f32 %v4486_v37, %v5588_v54 }
 0x1de   : > { %v2253_v59 = vadd.f32 1.0, %v3023_v7  ;;  %v2125_v48 = vadd.f32 %v2109_v1, %v2089_v9  ;;  %v2142_v15 = vmul.f32 0.5, %v5087_v36  ;;  %v2112_v52 = vmul.f32 %v4486_v37, %v5589_v2 }
 0x1df   : > { %2943 = vmatmul.mubr.msk.f32.gmra.mxu0 %vm2306_vm7, %v2284_v19  ;;  %3032 = vtanh.f32 %v2226_v4  ;;  %v2090_v23 = vadd.f32 %v2074_v26, %v2054_v28  ;;  %v2144_v29 = vmul.f32 0.5, %v5576_v24  ;;  %v2111_v62 = vmul.f32 %v4486_v37, %v5590_v10 }
 0x1e0   : > { %v2269_v43 = vmul.f32 %v2253_v59, %v2141_v49  ;;  %v2128_v41 = vadd.f32 %v2112_v52, %v2092_v34  ;;  %v2143_v12 = vmul.f32 0.5, %v5104_v30  ;;  %v2145_v55 = vmul.f32 0.5, %v5577_v42 }
 0x1e1   : > { %v2126_v44 = vadd.f32 %v2110_v40, %v2090_v23  ;;  %v2127_v22 = vadd.f32 %v2111_v62, %v5591_v27  ;;  %v2146_v17 = vmul.f32 0.5, %v5581_v45 }
 0x1e2   : > { %v2285_v18 = vmul.f32 %v2269_v43, %v2125_v48 }
 0x1e3   : > { %v3025_v0 = vpop.eup %3024 }
 0x1e4   : > { %2945 = vmatprep.mubr.msk.f32.mxu0 %vm2306_vm7, %v2285_v18  ;;  %v2254_v13 = vadd.f32 1.0, %v3025_v0 }
 0x1e6   : > { %v2270_v20 = vmul.f32 %v2254_v13, %v2142_v15 }
 0x1e7   : > { %v3027_v50 = vpop.eup %3026 }
 0x1e8   : > { %v3029_v5 = vpop.eup %3028  ;;  %v2286_v8 = vmul.f32 %v2270_v20, %v2126_v44  ;;  %v2256_v39 = vadd.f32 1.0, %v3027_v50 }
 0x1e9   : > { %v3031_v53 = vpop.eup %3030  ;;  %v2255_v36 = vadd.f32 1.0, %v3029_v5 }
 0x1ea   : > { %2946 = vmatmul.mubr.msk.f32.gmra.mxu0 %vm2306_vm7, %v2286_v8  ;;  %v2272_v56 = vmul.f32 %v2256_v39, %v2144_v29  ;;  %v2257_v61 = vadd.f32 1.0, %v3031_v53 }
 0x1eb   : > { %v2271_v34 = vmul.f32 %v2255_v36, %v2143_v12 }
 0x1ec   : > { %v3033_v46 = vpop.eup %3032  ;;  %v2288_v24 = vmul.f32 %v2272_v56, %v2128_v41  ;;  %v2273_v35 = vmul.f32 %v2257_v61, %v2145_v55 }
 0x1ed   : > { %v2287_v11 = vmul.f32 %v2271_v34, %v2127_v22  ;;  %v2258_v37 = vadd.f32 1.0, %v3033_v46 }
 0x1ee   : > { %v2289_v30 = vmul.f32 %v2273_v35, %v5592_v63 }
 0x1ef   : > { %2948 = vmatprep.mubr.msk.f32.mxu0 %vm2306_vm7, %v2287_v11  ;;  %v2274_v47 = vmul.f32 %v2258_v37, %v2146_v17 }
 0x1f0   : > { %2949 = vmatmul.mubr.msk.f32.gmra.mxu0 %vm2306_vm7, %v2288_v24 }
 0x1f1   : > { %2951 = vmatprep.mubr.msk.f32.mxu0 %vm2306_vm7, %v2289_v30  ;;  %v2290_v42 = vmul.f32 %v2274_v47, %v5126_v25 }
 0x1f4   : > { %2952 = vmatmul.mubr.msk.f32.gmra.mxu0 %vm2306_vm7, %v2290_v42 }
 0x26f   : > { %v2932_v45 = vpop.f32.mrf.mxu0 }
 0x270   : > { %v2427_v16 = vadd.f32 %v2932_v45, %v2739_v32 }
 0x271   : > { %v2421_v25 = vpop.f32.mrf.mxu0 }
 0x272   : > { %2501 = vst [vmem:[%s5181_s1 + $0x8] sm:$0xff] %v2427_v16  ;;  %v2422_v6 = vadd.f32 %v2739_v32, %v2421_v25 }
 0x274   : > { %2500 = vst [vmem:[%s5181_s1] sm:$0xff] %v2422_v6 }
 0x27b   : > { %v2935_v31 = vpop.f32.mrf.mxu0 }
 0x27c   : > { %v2437_v60 = vadd.f32 %v2935_v31, %v2739_v32 }
 0x27d   : > { %v2431_v57 = vpop.f32.mrf.mxu0 }
 0x27e   : > { %2503 = vst [vmem:[%s5181_s1 + $0x18] sm:$0xff] %v2437_v60  ;;  %v2432_v51 = vadd.f32 %v2739_v32, %v2431_v57 }
 0x280   : > { %2502 = vst [vmem:[%s5181_s1 + $0x10] sm:$0xff] %v2432_v51 }
 0x285   : > { %v2938_v33 = vpop.f32.mrf.mxu0 }
 0x286   : > { %v2447_v38 = vadd.f32 %v2938_v33, %v2739_v32 }
 0x287   : > { %v2441_v9 = vpop.f32.mrf.mxu0 }
 0x288   : > { %2505 = vst [vmem:[%s5181_s1 + $0x28] sm:$0xff] %v2447_v38  ;;  %v2442_v21 = vadd.f32 %v2739_v32, %v2441_v9 }
 0x28a   : > { %2504 = vst [vmem:[%s5181_s1 + $0x20] sm:$0xff] %v2442_v21 }
 0x293   : > { %v2941_v3 = vpop.f32.mrf.mxu0 }
 0x294   : > { %v2457_v7 = vadd.f32 %v2941_v3, %v2739_v32 }
 0x295   : > { %v2451_v19 = vpop.f32.mrf.mxu0 }
 0x296   : > { %2507 = vst [vmem:[%s5181_s1 + $0x38] sm:$0xff] %v2457_v7  ;;  %v2452_v4 = vadd.f32 %v2739_v32, %v2451_v19 }
 0x298   : > { %2506 = vst [vmem:[%s5181_s1 + $0x30] sm:$0xff] %v2452_v4 }
 0x29f   : > { %v2944_v58 = vpop.f32.mrf.mxu0 }
 0x2a0   : > { %v2467_v1 = vadd.f32 %v2944_v58, %v2739_v32 }
 0x2a1   : > { %v2461_v49 = vpop.f32.mrf.mxu0 }
 0x2a2   : > { %2509 = vst [vmem:[%s5181_s1 + $0x48] sm:$0xff] %v2467_v1  ;;  %v2462_v59 = vadd.f32 %v2739_v32, %v2461_v49 }
 0x2a4   : > { %2508 = vst [vmem:[%s5181_s1 + $0x40] sm:$0xff] %v2462_v59 }
 0x2aa   : > { %v2947_v28 = vpop.f32.mrf.mxu0 }
 0x2ab   : > { %v2477_v14 = vadd.f32 %v2947_v28, %v2739_v32 }
 0x2ac   : > { %v2471_v26 = vpop.f32.mrf.mxu0 }
 0x2ad   : > { %2511 = vst [vmem:[%s5181_s1 + $0x58] sm:$0xff] %v2477_v14  ;;  %v2472_v48 = vadd.f32 %v2739_v32, %v2471_v26 }
 0x2af   : > { %2510 = vst [vmem:[%s5181_s1 + $0x50] sm:$0xff] %v2472_v48 }
 0x2b0   : > { %v2950_v43 = vpop.f32.mrf.mxu0 }
 0x2b1   : > { %v2487_v18 = vadd.f32 %v2950_v43, %v2739_v32 }
 0x2b2   : > { %v2481_v23 = vpop.f32.mrf.mxu0 }
 0x2b3   : > { %2513 = vst [vmem:[%s5181_s1 + $0x68] sm:$0xff] %v2487_v18  ;;  %v2482_v0 = vadd.f32 %v2739_v32, %v2481_v23 }
 0x2b4   : > { %v2953_v54 = vpop.f32.mrf.mxu0 }
 0x2b5   : > { %2512 = vst [vmem:[%s5181_s1 + $0x60] sm:$0xff] %v2482_v0  ;;  %v2497_v40 = vadd.f32 %v2953_v54, %v2739_v32 }
 0x2b6   : > { %v2491_v15 = vpop.f32.mrf.mxu0 }
 0x2b7   : > { %2515 = vst [vmem:[%s5181_s1 + $0x78] sm:$0xff] %v2497_v40  ;;  %v2492_v13 = vadd.f32 %v2739_v32, %v2491_v15 }
 0x2b9   : > { %2514 = vst [vmem:[%s5181_s1 + $0x70] sm:$0xff] %v2492_v13 }
 0x2ba PF: > { %s23_s29 = sadd.s32 1, %s3072_s29   ;;  %s5594_s18 = sld [smem:[#allocation2_spill]] }
 0x2bb   : > { %p20_p12 = scmp.ge.s32.totalorder %s23_s29, 6   ;;  %s5595_s25 = smov %s3064_s27 }
 0x2bc   : > { %s5596_s26 = smov %s3068_s28  ;;  %s5597_s27 = smov %s5600_s30 }
 0x2bd   :  { %22 = sbr.rel (!%p20_p12) target bundleno = 4 (0x4), region = 108 }
 0x2c0   : > { %s5598_s28 = smov %s5594_s18 }

</bundles_post_ra>
